<compile_context>
chip_gen: v7x
topology: tpu7x:2x2x1
jax: 0.10.0
libtpu: 0.0.40
codegen_flags: <defaults>
</compile_context>

<pallas_src>
import numpy as np
import jax
import jax.numpy as jnp
from jax import lax
from jax.experimental import pallas as pl
from jax.experimental.pallas import tpu as pltpu

F32 = jnp.float32
BF16 = jnp.bfloat16


# -----------------------------------------------------------------------------
# fused TransformerBlock kernel (batched-over-heads attention)
# -----------------------------------------------------------------------------
def _make_block_kernel(embed_dim, ff_dim, num_heads):
    E = embed_dim
    n = num_heads
    nE = n * E
    nn_ = n * n

    def kernel(x_ref, wqe_ref, wke_ref, wvt_ref, sred_ref, bexp_ref, gexp_ref,
               cred_ref, wo_ref, w1_ref, w2_ref, vecs_ref, o_ref):
        x = x_ref[...]                                   # (TR, E) f32
        xb = x.astype(BF16)                              # matmul operand only

        # coalesced bias / mask / LayerNorm vector slab (one operand)
        bqe = vecs_ref[0:1, :nE]
        bke = vecs_ref[1:2, :nE]
        bvt = vecs_ref[2:3, :nE]
        mbias = vecs_ref[3:4, :nn_]                      # 0 / -1e30 causal-over-head bias
        bo = vecs_ref[4:5, :E]
        g1 = vecs_ref[5:6, :E]
        b1 = vecs_ref[6:7, :E]
        c1 = vecs_ref[7:8, :ff_dim]
        c2 = vecs_ref[8:9, :E]
        g2 = vecs_ref[9:10, :E]
        b2 = vecs_ref[10:11, :E]

        # ---- attention across the HEAD index, all heads batched ---------------
        qe = jnp.dot(xb, wqe_ref[...], preferred_element_type=F32) + bqe   # (TR, nE)
        ke = jnp.dot(xb, wke_ref[...], preferred_element_type=F32) + bke   # (TR, nE)
        p = (qe * ke).astype(BF16)
        logits = jnp.dot(p, sred_ref[...], preferred_element_type=F32) + mbias  # (TR, nn)
        m = jnp.max(logits, axis=-1, keepdims=True)      # row max >= every head's max
        e = jnp.exp(logits - m)                          # masked lanes -> exactly 0
        eb = e.astype(BF16)
        ee = jnp.dot(eb, bexp_ref[...], preferred_element_type=F32)        # (TR, nE)
        vt = jnp.dot(xb, wvt_ref[...], preferred_element_type=F32) + bvt   # (TR, nE)
        ev = (ee * vt).astype(BF16)
        ctx_un = jnp.dot(ev, cred_ref[...], preferred_element_type=F32)    # (TR, E)
        denom = jnp.dot(eb, gexp_ref[...], preferred_element_type=F32)     # (TR, E)
        ctx = ctx_un * pl.reciprocal(denom, approx=True)                   # EUP slot

        # ---- output projection + residual + LayerNorm -------------------------
        proj = jnp.dot(ctx.astype(BF16), wo_ref[...], preferred_element_type=F32) + bo
        s1 = x + proj
        mu1 = jnp.mean(s1, axis=-1, keepdims=True)
        var1 = jnp.mean((s1 - mu1) * (s1 - mu1), axis=-1, keepdims=True)
        h1 = (s1 - mu1) * lax.rsqrt(var1 + 1e-5) * g1 + b1

        # ---- feed-forward + residual + LayerNorm -------------------------------
        f = jnp.dot(h1.astype(BF16), w1_ref[...], preferred_element_type=F32) + c1
        f = jnp.maximum(f, 0.0)
        f = jnp.dot(f.astype(BF16), w2_ref[...], preferred_element_type=F32) + c2
        s2 = h1 + f
        mu2 = jnp.mean(s2, axis=-1, keepdims=True)
        var2 = jnp.mean((s2 - mu2) * (s2 - mu2), axis=-1, keepdims=True)
        o_ref[...] = (s2 - mu2) * lax.rsqrt(var2 + 1e-5) * g2 + b2

    return kernel


# -----------------------------------------------------------------------------
# parameter construction (plain, torch-like) -- done once
# -----------------------------------------------------------------------------
def init_params(key, embed_dim, num_heads, ff_dim):
    hd = embed_dim // num_heads
    ks = jax.random.split(key, 6)

    def lin(k, fin, fout):
        kw, kb = jax.random.split(k)
        w = jax.random.normal(kw, (fin, fout), F32) / np.sqrt(fin)
        b = jax.random.normal(kb, (fout,), F32) * 0.02
        return w, b

    p = {}
    p['wq'], p['bq'] = lin(ks[0], hd, hd)
    p['wk'], p['bk'] = lin(ks[1], hd, hd)
    p['wv'], p['bv'] = lin(ks[2], hd, hd)
    p['wo'], p['bo'] = lin(ks[3], embed_dim, embed_dim)
    p['ln1_g'] = jnp.ones((embed_dim,), F32)
    p['ln1_b'] = jnp.zeros((embed_dim,), F32)
    p['w1'], p['b1'] = lin(ks[4], embed_dim, ff_dim)
    p['w2'], p['b2'] = lin(ks[5], ff_dim, embed_dim)
    p['ln2_g'] = jnp.ones((embed_dim,), F32)
    p['ln2_b'] = jnp.zeros((embed_dim,), F32)
    return p


# -----------------------------------------------------------------------------
# one-time operand folding: per-head Linears + einops rearranges + head
# expansion/tiling/reduction selectors, all baked into MXU-friendly matrices.
# -----------------------------------------------------------------------------
def prepare_operands(params, num_heads):
    E = params['wo'].shape[0]
    n = num_heads
    hd = E // n
    nE = n * E
    nn_ = n * n
    ff = params['w1'].shape[1]
    scale = 1.0 / np.sqrt(hd)

    def blockify(w):
        # per-head (hd,hd) Linear -> (E,E) on the flat embedding:
        # rows in '(w n)' order (reference input split), cols in '(n w)' order.
        blk = np.zeros((E, E), np.float64)
        wnp = np.asarray(w, np.float64)
        for h in range(n):
            rows = np.arange(hd) * n + h
            cols = h * hd + np.arange(hd)
            blk[np.ix_(rows, cols)] = wnp
        return blk

    # 0/1 placement selectors (exact in bf16)
    aq = np.zeros((E, nE), np.float64)       # expand q_h across key-head blocks
    ak = np.zeros((E, nE), np.float64)       # tile k / v across query-head blocks
    s_red = np.zeros((nE, nn_), np.float64)  # reduce over w -> (h, m) logits
    b_exp = np.zeros((nn_, nE), np.float64)  # expand e[h,m] across w
    g_exp = np.zeros((nn_, E), np.float64)   # sum over m, broadcast over w
    c_red = np.zeros((nE, E), np.float64)    # reduce over m -> context
    for h in range(n):
        for m_ in range(n):
            for w in range(hd):
                col = h * E + m_ * hd + w
                aq[h * hd + w, col] = 1.0
                ak[m_ * hd + w, col] = 1.0
                s_red[col, h * n + m_] = 1.0
                b_exp[h * n + m_, col] = 1.0
                c_red[col, h * hd + w] = 1.0
            g_exp[h * n + m_, h * hd + np.arange(hd)] = 1.0

    # fold projection Linears with the expansion/tiling selectors; fold the
    # 1/sqrt(hd) attention scale into the query path.
    wqe = (blockify(params['wq']) @ aq) * scale
    wke = blockify(params['wk']) @ ak
    wvt = blockify(params['wv']) @ ak
    bqe = np.tile(np.asarray(params['bq'], np.float64), nn_) * scale
    bke = np.tile(np.asarray(params['bk'], np.float64), nn_)
    bvt = np.tile(np.asarray(params['bv'], np.float64), nn_)

    # causal mask over the head index as an additive bias
    mb = np.where(np.tril(np.ones((n, n))) > 0, 0.0, -1e30).reshape(nn_)

    # coalesce all small vectors into one slab (one DMA stream, one VMEM buffer)
    vec_w = max(nE, ff, E, nn_)
    vecs = np.zeros((11, vec_w), np.float32)
    vecs[0, :nE] = bqe
    vecs[1, :nE] = bke
    vecs[2, :nE] = bvt
    vecs[3, :nn_] = mb
    vecs[4, :E] = np.asarray(params['bo'])
    vecs[5, :E] = np.asarray(params['ln1_g'])
    vecs[6, :E] = np.asarray(params['ln1_b'])
    vecs[7, :ff] = np.asarray(params['b1'])
    vecs[8, :E] = np.asarray(params['b2'])
    vecs[9, :E] = np.asarray(params['ln2_g'])
    vecs[10, :E] = np.asarray(params['ln2_b'])

    return {
        'wqe': jnp.asarray(wqe, BF16), 'wke': jnp.asarray(wke, BF16),
        'wvt': jnp.asarray(wvt, BF16),
        's_red': jnp.asarray(s_red, BF16), 'b_exp': jnp.asarray(b_exp, BF16),
        'g_exp': jnp.asarray(g_exp, BF16), 'c_red': jnp.asarray(c_red, BF16),
        'wo': jnp.asarray(params['wo'], BF16),
        'w1': jnp.asarray(params['w1'], BF16), 'w2': jnp.asarray(params['w2'], BF16),
        'vecs': jnp.asarray(vecs, F32),
        'embed_dim': E, 'ff_dim': ff, 'num_heads': n,
    }


# -----------------------------------------------------------------------------
# forward pass (single fused pallas_call)
# -----------------------------------------------------------------------------
def transformer_block_forward(x, ops, *, row_tile=64):
    B, S, E = x.shape
    R = B * S
    TR = row_tile                                   # vreg-pressure-safe with E=32
    n_tiles = max(2, (R + TR - 1) // TR)            # >=2 grid steps (v7x: 2 TCs)
    R_pad = n_tiles * TR
    x2 = x.reshape(R, E)
    if R_pad != R:
        x2 = jnp.pad(x2, ((0, R_pad - R), (0, 0)))

    mat_names = ['wqe', 'wke', 'wvt', 's_red', 'b_exp', 'g_exp', 'c_red',
                 'wo', 'w1', 'w2']
    mats = [ops[nm] for nm in mat_names]
    operands = [x2] + mats + [ops['vecs']]

    def const_spec(shape):
        nd = len(shape)
        return pl.BlockSpec(shape, lambda i: (0,) * nd)

    in_specs = [pl.BlockSpec((TR, E), lambda i: (i, 0))]
    in_specs += [const_spec(a.shape) for a in mats]
    in_specs += [const_spec(ops['vecs'].shape)]

    out = pl.pallas_call(
        _make_block_kernel(E, ops['ff_dim'], ops['num_heads']),
        grid=(n_tiles,),
        in_specs=in_specs,
        out_specs=pl.BlockSpec((TR, E), lambda i: (i, 0)),
        out_shape=jax.ShapeDtypeStruct((R_pad, E), F32),
        compiler_params=pltpu.CompilerParams(dimension_semantics=("parallel",)),
    )(*operands)
    return out[:R].reshape(B, S, E)


# -----------------------------------------------------------------------------
# pure-JAX reference (mirrors the PyTorch module exactly, eval mode, f32)
# -----------------------------------------------------------------------------
def transformer_block_reference(x, p, *, num_heads):
    hi = lax.Precision.HIGHEST
    B, S, E = x.shape
    n = num_heads
    hd = E // n
    x4 = x.reshape(B, S, hd, n).transpose(0, 1, 3, 2)          # 'b d (w n)->b d n w'
    q = jnp.matmul(x4, p['wq'], precision=hi) + p['bq']
    k = jnp.matmul(x4, p['wk'], precision=hi) + p['bk']
    v = jnp.matmul(x4, p['wv'], precision=hi) + p['bv']
    logits = jnp.einsum('bsnw,bsmw->bsnm', q, k, precision=hi) / np.sqrt(hd)
    mask = np.tril(np.ones((n, n), np.float32))
    logits = jnp.where(mask[None, None, :, :] > 0, logits, -jnp.inf)
    att = jax.nn.softmax(logits, axis=-1)
    vals = jnp.einsum('bsnm,bsmw->bsnw', att, v, precision=hi)
    merged = vals.reshape(B, S, E)                              # 'b d n w->b d (n w)'
    proj = jnp.matmul(merged, p['wo'], precision=hi) + p['bo']

    def ln(y, g, b):
        mu = jnp.mean(y, axis=-1, keepdims=True)
        var = jnp.mean((y - mu) ** 2, axis=-1, keepdims=True)
        return (y - mu) / jnp.sqrt(var + 1e-5) * g + b

    h1 = ln(x + proj, p['ln1_g'], p['ln1_b'])
    f = jnp.maximum(jnp.matmul(h1, p['w1'], precision=hi) + p['b1'], 0.0)
    f = jnp.matmul(f, p['w2'], precision=hi) + p['b2']
    return ln(h1 + f, p['ln2_g'], p['ln2_b'])


# -----------------------------------------------------------------------------
if __name__ == "__main__":
    B, S, E = 2, 8, 32          # batch=2, seq=8, embed_dim=32
    num_heads = 8               # head_dim = 4
    ff_dim = 64

    key = jax.random.PRNGKey(0)
    kx, kp = jax.random.split(key)
    x = jax.random.normal(kx, (B, S, E), F32)
    params = init_params(kp, E, num_heads, ff_dim)
    ops = prepare_operands(params, num_heads)    # folded bf16 weights, built once

    y = transformer_block_forward(x, ops)
    jax.block_until_ready(y)

    y_ref = transformer_block_reference(x, params, num_heads=num_heads)
    assert y.shape == (B, S, E)
    assert bool(jnp.all(jnp.isfinite(y)))
    # bf16 matmul operands (deliberate, MXU-native) => relaxed tolerance vs the
    # f32 HIGHEST-precision reference; a structural bug would produce O(1) errors.
    np.testing.assert_allclose(np.asarray(y), np.asarray(y_ref), atol=5e-2, rtol=5e-2)
    print("KERNEL_OK")
</pallas_src>

<mosaic_0001>
module attributes {stable_mosaic.version = 11 : i64} {
  func.func @kernel(%arg0: i32, %arg1: memref<64x32xf32, #tpu.memory_space<vmem>>, %arg2: memref<32x256xbf16, #tpu.memory_space<vmem>>, %arg3: memref<32x256xbf16, #tpu.memory_space<vmem>>, %arg4: memref<32x256xbf16, #tpu.memory_space<vmem>>, %arg5: memref<256x64xbf16, #tpu.memory_space<vmem>>, %arg6: memref<64x256xbf16, #tpu.memory_space<vmem>>, %arg7: memref<64x32xbf16, #tpu.memory_space<vmem>>, %arg8: memref<256x32xbf16, #tpu.memory_space<vmem>>, %arg9: memref<32x32xbf16, #tpu.memory_space<vmem>>, %arg10: memref<32x64xbf16, #tpu.memory_space<vmem>>, %arg11: memref<64x32xbf16, #tpu.memory_space<vmem>>, %arg12: memref<11x256xf32, #tpu.memory_space<vmem>>, %arg13: memref<64x32xf32, #tpu.memory_space<vmem>>) attributes {dimension_semantics = [#tpu.dimension_semantics<parallel>], iteration_bounds = array<i64: 2>, scalar_prefetch = 0 : i64, scratch_operands = 0 : i64, tpu.core_type = #tpu.core_type<tc>, window_params = [{transform_indices = @transform_0, window_bounds = array<i64: 64, 32>}, {pipeline_mode = #tpu.pipeline_mode<synchronous>, transform_indices = @transform_1, window_bounds = array<i64: 32, 256>}, {pipeline_mode = #tpu.pipeline_mode<synchronous>, transform_indices = @transform_2, window_bounds = array<i64: 32, 256>}, {pipeline_mode = #tpu.pipeline_mode<synchronous>, transform_indices = @transform_3, window_bounds = array<i64: 32, 256>}, {pipeline_mode = #tpu.pipeline_mode<synchronous>, transform_indices = @transform_4, window_bounds = array<i64: 256, 64>}, {pipeline_mode = #tpu.pipeline_mode<synchronous>, transform_indices = @transform_5, window_bounds = array<i64: 64, 256>}, {pipeline_mode = #tpu.pipeline_mode<synchronous>, transform_indices = @transform_6, window_bounds = array<i64: 64, 32>}, {pipeline_mode = #tpu.pipeline_mode<synchronous>, transform_indices = @transform_7, window_bounds = array<i64: 256, 32>}, {pipeline_mode = #tpu.pipeline_mode<synchronous>, transform_indices = @transform_8, window_bounds = array<i64: 32, 32>}, {pipeline_mode = #tpu.pipeline_mode<synchronous>, transform_indices = @transform_9, window_bounds = array<i64: 32, 64>}, {pipeline_mode = #tpu.pipeline_mode<synchronous>, transform_indices = @transform_10, window_bounds = array<i64: 64, 32>}, {pipeline_mode = #tpu.pipeline_mode<synchronous>, transform_indices = @transform_11, window_bounds = array<i64: 11, 256>}, {transform_indices = @transform_12, window_bounds = array<i64: 64, 32>}]} {
    %c0 = arith.constant 0 : index
    %c0_0 = arith.constant 0 : index
    %0 = vector.load %arg1[%c0, %c0_0] : memref<64x32xf32, #tpu.memory_space<vmem>>, vector<64x32xf32>
    %1 = arith.truncf %0 : vector<64x32xf32> to vector<64x32xbf16>
    %c0_1 = arith.constant 0 : index
    %c0_2 = arith.constant 0 : index
    %2 = vector.load %arg12[%c0_1, %c0_2] : memref<11x256xf32, #tpu.memory_space<vmem>>, vector<1x256xf32>
    %c1 = arith.constant 1 : index
    %c0_3 = arith.constant 0 : index
    %3 = vector.load %arg12[%c1, %c0_3] : memref<11x256xf32, #tpu.memory_space<vmem>>, vector<1x256xf32>
    %c2 = arith.constant 2 : index
    %c0_4 = arith.constant 0 : index
    %4 = vector.load %arg12[%c2, %c0_4] : memref<11x256xf32, #tpu.memory_space<vmem>>, vector<1x256xf32>
    %c3 = arith.constant 3 : index
    %c0_5 = arith.constant 0 : index
    %5 = vector.load %arg12[%c3, %c0_5] : memref<11x256xf32, #tpu.memory_space<vmem>>, vector<1x64xf32>
    %c4 = arith.constant 4 : index
    %c0_6 = arith.constant 0 : index
    %6 = vector.load %arg12[%c4, %c0_6] : memref<11x256xf32, #tpu.memory_space<vmem>>, vector<1x32xf32>
    %c5 = arith.constant 5 : index
    %c0_7 = arith.constant 0 : index
    %7 = vector.load %arg12[%c5, %c0_7] : memref<11x256xf32, #tpu.memory_space<vmem>>, vector<1x32xf32>
    %c6 = arith.constant 6 : index
    %c0_8 = arith.constant 0 : index
    %8 = vector.load %arg12[%c6, %c0_8] : memref<11x256xf32, #tpu.memory_space<vmem>>, vector<1x32xf32>
    %c7 = arith.constant 7 : index
    %c0_9 = arith.constant 0 : index
    %9 = vector.load %arg12[%c7, %c0_9] : memref<11x256xf32, #tpu.memory_space<vmem>>, vector<1x64xf32>
    %c8 = arith.constant 8 : index
    %c0_10 = arith.constant 0 : index
    %10 = vector.load %arg12[%c8, %c0_10] : memref<11x256xf32, #tpu.memory_space<vmem>>, vector<1x32xf32>
    %c9 = arith.constant 9 : index
    %c0_11 = arith.constant 0 : index
    %11 = vector.load %arg12[%c9, %c0_11] : memref<11x256xf32, #tpu.memory_space<vmem>>, vector<1x32xf32>
    %c10 = arith.constant 10 : index
    %c0_12 = arith.constant 0 : index
    %12 = vector.load %arg12[%c10, %c0_12] : memref<11x256xf32, #tpu.memory_space<vmem>>, vector<1x32xf32>
    %c0_13 = arith.constant 0 : index
    %c0_14 = arith.constant 0 : index
    %13 = vector.load %arg2[%c0_13, %c0_14] : memref<32x256xbf16, #tpu.memory_space<vmem>>, vector<32x256xbf16>
    %cst = arith.constant dense<0.000000e+00> : vector<64x256xf32>
    %14 = tpu.matmul %1, %13, %cst {dimension_numbers = #tpu.dot_dimension_numbers<[1], [0], [0], [1], [0, 0, 1, 1], [], []>} : vector<64x32xbf16>, vector<32x256xbf16>, vector<64x256xf32> -> vector<64x256xf32>
    %15 = vector.broadcast %2 : vector<1x256xf32> to vector<64x256xf32>
    %16 = arith.addf %14, %15 : vector<64x256xf32>
    %c0_15 = arith.constant 0 : index
    %c0_16 = arith.constant 0 : index
    %17 = vector.load %arg3[%c0_15, %c0_16] : memref<32x256xbf16, #tpu.memory_space<vmem>>, vector<32x256xbf16>
    %cst_17 = arith.constant dense<0.000000e+00> : vector<64x256xf32>
    %18 = tpu.matmul %1, %17, %cst_17 {dimension_numbers = #tpu.dot_dimension_numbers<[1], [0], [0], [1], [0, 0, 1, 1], [], []>} : vector<64x32xbf16>, vector<32x256xbf16>, vector<64x256xf32> -> vector<64x256xf32>
    %19 = vector.broadcast %3 : vector<1x256xf32> to vector<64x256xf32>
    %20 = arith.addf %18, %19 : vector<64x256xf32>
    %21 = arith.mulf %16, %20 : vector<64x256xf32>
    %22 = arith.truncf %21 : vector<64x256xf32> to vector<64x256xbf16>
    %c0_18 = arith.constant 0 : index
    %c0_19 = arith.constant 0 : index
    %23 = vector.load %arg5[%c0_18, %c0_19] : memref<256x64xbf16, #tpu.memory_space<vmem>>, vector<256x64xbf16>
    %cst_20 = arith.constant dense<0.000000e+00> : vector<64x64xf32>
    %24 = tpu.matmul %22, %23, %cst_20 {dimension_numbers = #tpu.dot_dimension_numbers<[1], [0], [0], [1], [0, 0, 1, 1], [], []>} : vector<64x256xbf16>, vector<256x64xbf16>, vector<64x64xf32> -> vector<64x64xf32>
    %25 = vector.broadcast %5 : vector<1x64xf32> to vector<64x64xf32>
    %26 = arith.addf %24, %25 : vector<64x64xf32>
    %cst_21 = arith.constant dense<0xFF800000> : vector<64xf32>
    %27 = vector.multi_reduction <maximumf>, %26, %cst_21 [1] : vector<64x64xf32> to vector<64xf32>
    %28 = vector.shape_cast %27 : vector<64xf32> to vector<64x1xf32>
    %29 = vector.broadcast %28 : vector<64x1xf32> to vector<64x64xf32>
    %30 = arith.subf %26, %29 : vector<64x64xf32>
    %31 = math.exp %30 : vector<64x64xf32>
    %32 = arith.truncf %31 : vector<64x64xf32> to vector<64x64xbf16>
    %c0_22 = arith.constant 0 : index
    %c0_23 = arith.constant 0 : index
    %33 = vector.load %arg6[%c0_22, %c0_23] : memref<64x256xbf16, #tpu.memory_space<vmem>>, vector<64x256xbf16>
    %cst_24 = arith.constant dense<0.000000e+00> : vector<64x256xf32>
    %34 = tpu.matmul %32, %33, %cst_24 {dimension_numbers = #tpu.dot_dimension_numbers<[1], [0], [0], [1], [0, 0, 1, 1], [], []>} : vector<64x64xbf16>, vector<64x256xbf16>, vector<64x256xf32> -> vector<64x256xf32>
    %c0_25 = arith.constant 0 : index
    %c0_26 = arith.constant 0 : index
    %35 = vector.load %arg4[%c0_25, %c0_26] : memref<32x256xbf16, #tpu.memory_space<vmem>>, vector<32x256xbf16>
    %cst_27 = arith.constant dense<0.000000e+00> : vector<64x256xf32>
    %36 = tpu.matmul %1, %35, %cst_27 {dimension_numbers = #tpu.dot_dimension_numbers<[1], [0], [0], [1], [0, 0, 1, 1], [], []>} : vector<64x32xbf16>, vector<32x256xbf16>, vector<64x256xf32> -> vector<64x256xf32>
    %37 = vector.broadcast %4 : vector<1x256xf32> to vector<64x256xf32>
    %38 = arith.addf %36, %37 : vector<64x256xf32>
    %39 = arith.mulf %34, %38 : vector<64x256xf32>
    %40 = arith.truncf %39 : vector<64x256xf32> to vector<64x256xbf16>
    %c0_28 = arith.constant 0 : index
    %c0_29 = arith.constant 0 : index
    %41 = vector.load %arg8[%c0_28, %c0_29] : memref<256x32xbf16, #tpu.memory_space<vmem>>, vector<256x32xbf16>
    %cst_30 = arith.constant dense<0.000000e+00> : vector<64x32xf32>
    %42 = tpu.matmul %40, %41, %cst_30 {dimension_numbers = #tpu.dot_dimension_numbers<[1], [0], [0], [1], [0, 0, 1, 1], [], []>} : vector<64x256xbf16>, vector<256x32xbf16>, vector<64x32xf32> -> vector<64x32xf32>
    %c0_31 = arith.constant 0 : index
    %c0_32 = arith.constant 0 : index
    %43 = vector.load %arg7[%c0_31, %c0_32] : memref<64x32xbf16, #tpu.memory_space<vmem>>, vector<64x32xbf16>
    %cst_33 = arith.constant dense<0.000000e+00> : vector<64x32xf32>
    %44 = tpu.matmul %32, %43, %cst_33 {dimension_numbers = #tpu.dot_dimension_numbers<[1], [0], [0], [1], [0, 0, 1, 1], [], []>} : vector<64x64xbf16>, vector<64x32xbf16>, vector<64x32xf32> -> vector<64x32xf32>
    %45 = tpu.reciprocal %44 {approx = true} : vector<64x32xf32> -> vector<64x32xf32>
    %46 = arith.mulf %42, %45 : vector<64x32xf32>
    %47 = arith.truncf %46 : vector<64x32xf32> to vector<64x32xbf16>
    %c0_34 = arith.constant 0 : index
    %c0_35 = arith.constant 0 : index
    %48 = vector.load %arg9[%c0_34, %c0_35] : memref<32x32xbf16, #tpu.memory_space<vmem>>, vector<32x32xbf16>
    %cst_36 = arith.constant dense<0.000000e+00> : vector<64x32xf32>
    %49 = tpu.matmul %47, %48, %cst_36 {dimension_numbers = #tpu.dot_dimension_numbers<[1], [0], [0], [1], [0, 0, 1, 1], [], []>} : vector<64x32xbf16>, vector<32x32xbf16>, vector<64x32xf32> -> vector<64x32xf32>
    %50 = vector.broadcast %6 : vector<1x32xf32> to vector<64x32xf32>
    %51 = arith.addf %49, %50 : vector<64x32xf32>
    %52 = arith.addf %0, %51 : vector<64x32xf32>
    %cst_37 = arith.constant dense<0.000000e+00> : vector<64xf32>
    %53 = vector.multi_reduction <add>, %52, %cst_37 [1] : vector<64x32xf32> to vector<64xf32>
    %54 = vector.shape_cast %53 : vector<64xf32> to vector<64x1xf32>
    %cst_38 = arith.constant 3.200000e+01 : f32
    %55 = vector.broadcast %cst_38 : f32 to vector<64x1xf32>
    %56 = arith.divf %54, %55 : vector<64x1xf32>
    %57 = vector.broadcast %56 : vector<64x1xf32> to vector<64x32xf32>
    %58 = arith.subf %52, %57 : vector<64x32xf32>
    %59 = vector.broadcast %56 : vector<64x1xf32> to vector<64x32xf32>
    %60 = arith.subf %52, %59 : vector<64x32xf32>
    %61 = arith.mulf %58, %60 : vector<64x32xf32>
    %cst_39 = arith.constant dense<0.000000e+00> : vector<64xf32>
    %62 = vector.multi_reduction <add>, %61, %cst_39 [1] : vector<64x32xf32> to vector<64xf32>
    %63 = vector.shape_cast %62 : vector<64xf32> to vector<64x1xf32>
    %cst_40 = arith.constant 3.200000e+01 : f32
    %64 = vector.broadcast %cst_40 : f32 to vector<64x1xf32>
    %65 = arith.divf %63, %64 : vector<64x1xf32>
    %66 = vector.broadcast %56 : vector<64x1xf32> to vector<64x32xf32>
    %67 = arith.subf %52, %66 : vector<64x32xf32>
    %cst_41 = arith.constant 9.99999974E-6 : f32
    %68 = vector.broadcast %cst_41 : f32 to vector<64x1xf32>
    %69 = arith.addf %65, %68 : vector<64x1xf32>
    %70 = math.rsqrt %69 : vector<64x1xf32>
    %71 = vector.broadcast %70 : vector<64x1xf32> to vector<64x32xf32>
    %72 = arith.mulf %67, %71 : vector<64x32xf32>
    %73 = vector.broadcast %7 : vector<1x32xf32> to vector<64x32xf32>
    %74 = arith.mulf %72, %73 : vector<64x32xf32>
    %75 = vector.broadcast %8 : vector<1x32xf32> to vector<64x32xf32>
    %76 = arith.addf %74, %75 : vector<64x32xf32>
    %77 = arith.truncf %76 : vector<64x32xf32> to vector<64x32xbf16>
    %c0_42 = arith.constant 0 : index
    %c0_43 = arith.constant 0 : index
    %78 = vector.load %arg10[%c0_42, %c0_43] : memref<32x64xbf16, #tpu.memory_space<vmem>>, vector<32x64xbf16>
    %cst_44 = arith.constant dense<0.000000e+00> : vector<64x64xf32>
    %79 = tpu.matmul %77, %78, %cst_44 {dimension_numbers = #tpu.dot_dimension_numbers<[1], [0], [0], [1], [0, 0, 1, 1], [], []>} : vector<64x32xbf16>, vector<32x64xbf16>, vector<64x64xf32> -> vector<64x64xf32>
    %80 = vector.broadcast %9 : vector<1x64xf32> to vector<64x64xf32>
    %81 = arith.addf %79, %80 : vector<64x64xf32>
    %cst_45 = arith.constant 0.000000e+00 : f32
    %82 = vector.broadcast %cst_45 : f32 to vector<64x64xf32>
    %83 = arith.maximumf %81, %82 : vector<64x64xf32>
    %84 = arith.truncf %83 : vector<64x64xf32> to vector<64x64xbf16>
    %c0_46 = arith.constant 0 : index
    %c0_47 = arith.constant 0 : index
    %85 = vector.load %arg11[%c0_46, %c0_47] : memref<64x32xbf16, #tpu.memory_space<vmem>>, vector<64x32xbf16>
    %cst_48 = arith.constant dense<0.000000e+00> : vector<64x32xf32>
    %86 = tpu.matmul %84, %85, %cst_48 {dimension_numbers = #tpu.dot_dimension_numbers<[1], [0], [0], [1], [0, 0, 1, 1], [], []>} : vector<64x64xbf16>, vector<64x32xbf16>, vector<64x32xf32> -> vector<64x32xf32>
    %87 = vector.broadcast %10 : vector<1x32xf32> to vector<64x32xf32>
    %88 = arith.addf %86, %87 : vector<64x32xf32>
    %89 = arith.addf %76, %88 : vector<64x32xf32>
    %cst_49 = arith.constant dense<0.000000e+00> : vector<64xf32>
    %90 = vector.multi_reduction <add>, %89, %cst_49 [1] : vector<64x32xf32> to vector<64xf32>
    %91 = vector.shape_cast %90 : vector<64xf32> to vector<64x1xf32>
    %cst_50 = arith.constant 3.200000e+01 : f32
    %92 = vector.broadcast %cst_50 : f32 to vector<64x1xf32>
    %93 = arith.divf %91, %92 : vector<64x1xf32>
    %94 = vector.broadcast %93 : vector<64x1xf32> to vector<64x32xf32>
    %95 = arith.subf %89, %94 : vector<64x32xf32>
    %96 = vector.broadcast %93 : vector<64x1xf32> to vector<64x32xf32>
    %97 = arith.subf %89, %96 : vector<64x32xf32>
    %98 = arith.mulf %95, %97 : vector<64x32xf32>
    %cst_51 = arith.constant dense<0.000000e+00> : vector<64xf32>
    %99 = vector.multi_reduction <add>, %98, %cst_51 [1] : vector<64x32xf32> to vector<64xf32>
    %100 = vector.shape_cast %99 : vector<64xf32> to vector<64x1xf32>
    %cst_52 = arith.constant 3.200000e+01 : f32
    %101 = vector.broadcast %cst_52 : f32 to vector<64x1xf32>
    %102 = arith.divf %100, %101 : vector<64x1xf32>
    %103 = vector.broadcast %93 : vector<64x1xf32> to vector<64x32xf32>
    %104 = arith.subf %89, %103 : vector<64x32xf32>
    %cst_53 = arith.constant 9.99999974E-6 : f32
    %105 = vector.broadcast %cst_53 : f32 to vector<64x1xf32>
    %106 = arith.addf %102, %105 : vector<64x1xf32>
    %107 = math.rsqrt %106 : vector<64x1xf32>
    %108 = vector.broadcast %107 : vector<64x1xf32> to vector<64x32xf32>
    %109 = arith.mulf %104, %108 : vector<64x32xf32>
    %110 = vector.broadcast %11 : vector<1x32xf32> to vector<64x32xf32>
    %111 = arith.mulf %109, %110 : vector<64x32xf32>
    %112 = vector.broadcast %12 : vector<1x32xf32> to vector<64x32xf32>
    %113 = arith.addf %111, %112 : vector<64x32xf32>
    %c0_54 = arith.constant 0 : index
    %c0_55 = arith.constant 0 : index
    %114 = vector.load %arg13[%c0_54, %c0_55] : memref<64x32xf32, #tpu.memory_space<vmem>>, vector<64x32xf32>
    tpu.vector_store %arg13[%c0_54, %c0_55], %113 {strides = array<i32>} : memref<64x32xf32, #tpu.memory_space<vmem>>, vector<64x32xf32>,
    return
  }
  func.func @transform_0(%arg0: i32) -> (i32, i32) {
    %c0_i32 = arith.constant 0 : i32
    %c0_i32_0 = arith.constant 0 : i32
    return %arg0, %c0_i32 : i32, i32
  }
  func.func @transform_1(%arg0: i32) -> (i32, i32) {
    %c0_i32 = arith.constant 0 : i32
    %c0_i32_0 = arith.constant 0 : i32
    %c0_i32_1 = arith.constant 0 : i32
    return %c0_i32, %c0_i32_0 : i32, i32
  }
  func.func @transform_2(%arg0: i32) -> (i32, i32) {
    %c0_i32 = arith.constant 0 : i32
    %c0_i32_0 = arith.constant 0 : i32
    %c0_i32_1 = arith.constant 0 : i32
    return %c0_i32, %c0_i32_0 : i32, i32
  }
  func.func @transform_3(%arg0: i32) -> (i32, i32) {
    %c0_i32 = arith.constant 0 : i32
    %c0_i32_0 = arith.constant 0 : i32
    %c0_i32_1 = arith.constant 0 : i32
    return %c0_i32, %c0_i32_0 : i32, i32
  }
  func.func @transform_4(%arg0: i32) -> (i32, i32) {
    %c0_i32 = arith.constant 0 : i32
    %c0_i32_0 = arith.constant 0 : i32
    %c0_i32_1 = arith.constant 0 : i32
    return %c0_i32, %c0_i32_0 : i32, i32
  }
  func.func @transform_5(%arg0: i32) -> (i32, i32) {
    %c0_i32 = arith.constant 0 : i32
    %c0_i32_0 = arith.constant 0 : i32
    %c0_i32_1 = arith.constant 0 : i32
    return %c0_i32, %c0_i32_0 : i32, i32
  }
  func.func @transform_6(%arg0: i32) -> (i32, i32) {
    %c0_i32 = arith.constant 0 : i32
    %c0_i32_0 = arith.constant 0 : i32
    %c0_i32_1 = arith.constant 0 : i32
    return %c0_i32, %c0_i32_0 : i32, i32
  }
  func.func @transform_7(%arg0: i32) -> (i32, i32) {
    %c0_i32 = arith.constant 0 : i32
    %c0_i32_0 = arith.constant 0 : i32
    %c0_i32_1 = arith.constant 0 : i32
    return %c0_i32, %c0_i32_0 : i32, i32
  }
  func.func @transform_8(%arg0: i32) -> (i32, i32) {
    %c0_i32 = arith.constant 0 : i32
    %c0_i32_0 = arith.constant 0 : i32
    %c0_i32_1 = arith.constant 0 : i32
    return %c0_i32, %c0_i32_0 : i32, i32
  }
  func.func @transform_9(%arg0: i32) -> (i32, i32) {
    %c0_i32 = arith.constant 0 : i32
    %c0_i32_0 = arith.constant 0 : i32
    %c0_i32_1 = arith.constant 0 : i32
    return %c0_i32, %c0_i32_0 : i32, i32
  }
  func.func @transform_10(%arg0: i32) -> (i32, i32) {
    %c0_i32 = arith.constant 0 : i32
    %c0_i32_0 = arith.constant 0 : i32
    %c0_i32_1 = arith.constant 0 : i32
    return %c0_i32, %c0_i32_0 : i32, i32
  }
  func.func @transform_11(%arg0: i32) -> (i32, i32) {
    %c0_i32 = arith.constant 0 : i32
    %c0_i32_0 = arith.constant 0 : i32
    %c0_i32_1 = arith.constant 0 : i32
    return %c0_i32, %c0_i32_0 : i32, i32
  }
  func.func @transform_12(%arg0: i32) -> (i32, i32) {
    %c0_i32 = arith.constant 0 : i32
    %c0_i32_0 = arith.constant 0 : i32
    return %arg0, %c0_i32 : i32, i32
  }
}

</mosaic_0001>

<bundles_post_ra>
// kernel: tpu_custom_call.1
= control target key start
LH: loop header
LB: loop body
LE: loop exit
PB: predicated region body
PF: predicated region fallthrough
CT: control target
= control target key end

     0   :  { %s2651_s21 = smov 0   ;;  %s3278_s0 = inlined_call_operand.vmem [shape: f32[128,32], index: 0, kind: input, shape index: {}]   ;;  %s3279_s1 = inlined_call_operand.vmem [shape: bf16[32,256], index: 1, kind: input, shape index: {}]   ;;  %s3280_s2 = inlined_call_operand.vmem [shape: bf16[32,256], index: 2, kind: input, shape index: {}]   ;;  %s3281_s3 = inlined_call_operand.vmem [shape: bf16[32,256], index: 3, kind: input, shape index: {}]   ;;  %s3282_s4 = inlined_call_operand.vmem [shape: bf16[256,64], index: 4, kind: input, shape index: {}]   ;;  %s3283_s5 = inlined_call_operand.vmem [shape: bf16[64,256], index: 5, kind: input, shape index: {}]   ;;  %s3284_s6 = inlined_call_operand.vmem [shape: bf16[64,32], index: 6, kind: input, shape index: {}]   ;;  %s3285_s7 = inlined_call_operand.vmem [shape: bf16[256,32], index: 7, kind: input, shape index: {}]   ;;  %s3286_s8 = inlined_call_operand.vmem [shape: bf16[32,32], index: 8, kind: input, shape index: {}]   ;;  %s3287_s9 = inlined_call_operand.vmem [shape: bf16[32,64], index: 9, kind: input, shape index: {}]   ;;  %s3288_s10 = inlined_call_operand.vmem [shape: bf16[64,32], index: 10, kind: input, shape index: {}]   ;;  %s3289_s11 = inlined_call_operand.vmem [shape: f32[11,256], index: 11, kind: input, shape index: {}]   ;;  %s3290_s12 = inlined_call_operand.vmem [shape: f32[128,32], index: 12, kind: output, shape index: {}]  }
   0x1 LB: > { %s2149_s22 = sadd.s32 4294967295, %s2583_s21   ;;  %p2153_p0 = scmp.ge.s32.totalorder %s2583_s21, 1  ;;  %s2583_s21 = sphi %s2651_s21, %s22_s21  }
   0x2   : > { %p363_p1 = scmp.lt.s32.totalorder %s2583_s21, 3 }
   0x4   : > { %p364_p2 = pnand %p2153_p0, %p363_p1 }
   0x5   : > { %v2431_v0 = vld [vmem:[%s3279_s1 + $0x4] ss:$8 sps:$4 sm:$0xff] (!%p364_p2)   ;;  %s2154_s25 = sshll.u32 (!%p364_p2), %s2149_s22, 3  ;;  %v2585_v2 = vmov (!%p364_p2), 0   ;;  %v2435_v3 = vld [vmem:[%s3279_s1] ss:$8 sps:$4 sm:$0xff] (!%p364_p2)   ;;  %v448_v37 = vlaneseq (!%p364_p2) }
   0x6   : > { %367 = sbr.rel (%p364_p2) target bundleno = 2384 (0x950), region = 68  ;;  %v2433_v1 = vld [vmem:[%s3280_s2 + $0x4] ss:$8 sps:$4 sm:$0xff] (!%p364_p2)   ;;  %523 = vmatprep.mubr.bf16.mxu0 (!%p364_p2), %v2585_v2  ;;  %631 = vmatprep.mubr.bf16.mxu1 (!%p364_p2), %v2585_v2  ;;  %p406_p3 = scmp.lt.s32.totalorder (!%p364_p2), %s2154_s25, 15  ;;  %v2436_v4 = vld [vmem:[%s3280_s2] ss:$8 sps:$4 sm:$0xff] (!%p364_p2)  }
   0x7   : > { %491 = vmatprep.subr.bf16.mxu0 (!%p364_p2), %v2431_v0  ;;  %599 = vmatprep.subr.bf16.mxu1 (!%p364_p2), %v2433_v1  ;;  %v2437_v5 = vld [vmem:[%s3279_s1 + $0x14] ss:$8 sps:$4 sm:$0xff] (!%p364_p2)   ;;  %v2441_v7 = vld [vmem:[%s3279_s1 + $0x10] ss:$8 sps:$4 sm:$0xff] (!%p364_p2)   ;;  %v2443_v9 = vld [vmem:[%s3282_s4 + $0x40] sm:$0xff] (!%p364_p2)   ;;  %vm478_vm0 = vcmask (!%p364_p2), 261120  }
   0x8   : > { %492 = vmatpush1.bf16.msra.mxu0 (!%p364_p2), %v2435_v3  ;;  %600 = vmatpush1.bf16.msra.mxu1 (!%p364_p2), %v2436_v4  ;;  %v2439_v6 = vld [vmem:[%s3280_s2 + $0x14] ss:$8 sps:$4 sm:$0xff] (!%p364_p2)   ;;  %v2442_v8 = vld [vmem:[%s3280_s2 + $0x10] ss:$8 sps:$4 sm:$0xff] (!%p364_p2)   ;;  %v2444_v13 = vld [vmem:[%s3282_s4] sm:$0xff] (!%p364_p2)   ;;  %v449_v38 = vshrl.u32 (!%p364_p2), %v448_v37, 7 }
   0x9   : > { %493 = vmatprep.subr.bf16.mxu0 (!%p364_p2), %v2437_v5  ;;  %601 = vmatprep.subr.bf16.mxu1 (!%p364_p2), %v2439_v6  ;;  %v2445_v14 = vld [vmem:[%s3282_s4 + $0x48] sm:$0xff] (!%p364_p2)   ;;  %v2447_v18 = vld [vmem:[%s3282_s4 + $0x50] sm:$0xff] (!%p364_p2)   ;;  %v2449_v23 = vld [vmem:[%s3282_s4 + $0x58] sm:$0xff] (!%p364_p2)   ;;  %vm889_vm1 = vcmask (!%p364_p2), 523264  }
   0xa   : > { %v2446_v17 = vld [vmem:[%s3282_s4 + $0x8] sm:$0xff] (!%p364_p2)   ;;  %v2448_v20 = vld [vmem:[%s3282_s4 + $0x10] sm:$0xff] (!%p364_p2)   ;;  %v2450_v24 = vld [vmem:[%s3282_s4 + $0x18] sm:$0xff] (!%p364_p2)   ;;  %v2785_v40 = vsub.s32 (!%p364_p2), 0, %v449_v38  ;;  %v2790_v42 = vsub.s32 (!%p364_p2), 1, %v449_v38 }
   0xb   : > { %v2451_v25 = vld [vmem:[%s3282_s4 + $0x60] sm:$0xff] (!%p364_p2)   ;;  %v2453_v28 = vld [vmem:[%s3282_s4 + $0x68] sm:$0xff] (!%p364_p2)   ;;  %v2455_v33 = vld [vmem:[%s3282_s4 + $0x70] sm:$0xff] (!%p364_p2)  }
   0xc   : > { %494 = vmatpush1.bf16.msra.mxu0 (!%p364_p2), %v2441_v7  ;;  %602 = vmatpush1.bf16.msra.mxu1 (!%p364_p2), %v2442_v8  ;;  %v2452_v27 = vld [vmem:[%s3282_s4 + $0x20] sm:$0xff] (!%p364_p2)   ;;  %v2454_v31 = vld [vmem:[%s3282_s4 + $0x28] sm:$0xff] (!%p364_p2)   ;;  %v2456_v34 = vld [vmem:[%s3282_s4 + $0x30] sm:$0xff] (!%p364_p2)  }
   0xd   : > { %s3292_s25 = smov (!%p406_p3, %s2154_s25), 15  ;;  %2258 = vmatprep.subr.bf16.mxu0 %v2443_v9  ;;  %v2457_v35 = vld [vmem:[%s3282_s4 + $0x78] sm:$0xff]   ;;  %v430_v39 = vld [vmem:[%s3289_s11] ss:$8 sm:$0x3] }
   0xe   : > { %s2155_s23 = sshll.u32 %s3292_s25, 3  ;;  %v2458_v36 = vld [vmem:[%s3282_s4 + $0x38] sm:$0xff]   ;;  %v2158_v41 = vld [vmem:[%s3289_s11 + $0x1] ss:$8 sm:$0x3]  ;;  %v2793_v43 = vrot.slane %v430_v39, %v2785_v40  ;;  %v2799_v45 = vrot.slane %v430_v39, %v2790_v42 }
   0xf   : > { %s2696_s29 = scalar_lea.vmem %s3278_s0, %s2155_s23  ;;  %v2796_v44 = vrot.slane %v2158_v41, %v2785_v40  ;;  %v2802_v46 = vrot.slane %v2158_v41, %v2790_v42  ;;  %s3251_s18 = scalar_lea.vmem %s3290_s12, %s2155_s23 }
  0x10   : > { %v418_v10 = vld [vmem:[%s2696_s29] sm:$0xff]  ;;  %v419_v11 = vld [vmem:[%s2696_s29 + $0x8] sm:$0xff]  ;;  %v420_v15 = vld [vmem:[%s2696_s29 + $0x10] sm:$0xff] }
  0x11   : > { %v2700_v12 = vpack.c.bf16 %v419_v11, %v418_v10  ;;  %v421_v16 = vld [vmem:[%s2696_s29 + $0x18] sm:$0xff]  ;;  %v422_v21 = vld [vmem:[%s2696_s29 + $0x20] sm:$0xff]  ;;  %v423_v22 = vld [vmem:[%s2696_s29 + $0x28] sm:$0xff] }
  0x12   : > { %v2722_v19 = vpack.c.bf16 %v421_v16, %v420_v15  ;;  %v2744_v26 = vpack.c.bf16 %v423_v22, %v422_v21  ;;  %v424_v29 = vld [vmem:[%s2696_s29 + $0x30] sm:$0xff]  ;;  %v425_v30 = vld [vmem:[%s2696_s29 + $0x38] sm:$0xff] }
  0x13   : > { %2164 = vmatmul.mubr.msk.bf16.vlgmr.msra.gmra.mrb[0].mxu0 %vm478_vm0, %v2700_v12  ;;  %2172 = vmatmul.mubr.msk.bf16.vlgmr.msra.gmra.mrb[0].mxu1 %vm478_vm0, %v2700_v12  ;;  %v2763_v32 = vpack.c.bf16 %v425_v30, %v424_v29 }
  0x14   : > { %533 = vmatprep.mubr.bf16.mxu0 %v2585_v2  ;;  %641 = vmatprep.mubr.bf16.mxu1 %v2585_v2 }
  0x15   : > { %2259 = vmatpush3.bf16.msra.mxu0 %v2444_v13 }
  0x16   : > { %2260 = vmatprep.subr.bf16.mxu0 %v2445_v14 }
  0x19   : > { %2261 = vmatpush3.bf16.msra.mxu0 %v2446_v17 }
  0x1a   : > { %2262 = vmatprep.subr.bf16.mxu0 %v2447_v18 }
  0x1b   : > { %2165 = vmatmul.mubr.msk.bf16.gmra.mrb[4].mxu0 %vm478_vm0, %v2722_v19  ;;  %2173 = vmatmul.mubr.msk.bf16.gmra.mrb[4].mxu1 %vm478_vm0, %v2722_v19 }
  0x1c   : > { %543 = vmatprep.mubr.bf16.mxu0 %v2585_v2  ;;  %651 = vmatprep.mubr.bf16.mxu1 %v2585_v2 }
  0x1d   : > { %2263 = vmatpush3.bf16.msra.mxu0 %v2448_v20 }
  0x1e   : > { %2264 = vmatprep.subr.bf16.mxu0 %v2449_v23 }
  0x21   : > { %2265 = vmatpush3.bf16.msra.mxu0 %v2450_v24 }
  0x22   : > { %2266 = vmatprep.subr.bf16.mxu0 %v2451_v25 }
  0x23   : > { %2166 = vmatmul.mubr.msk.bf16.gmra.mrb[8].mxu0 %vm478_vm0, %v2744_v26  ;;  %2174 = vmatmul.mubr.msk.bf16.gmra.mrb[8].mxu1 %vm478_vm0, %v2744_v26 }
  0x24   : > { %553 = vmatprep.mubr.bf16.mxu0 %v2585_v2  ;;  %661 = vmatprep.mubr.bf16.mxu1 %v2585_v2 }
  0x25   : > { %2267 = vmatpush3.bf16.msra.mxu0 %v2452_v27 }
  0x26   : > { %2268 = vmatprep.subr.bf16.mxu0 %v2453_v28 }
  0x29   : > { %2269 = vmatpush3.bf16.msra.mxu0 %v2454_v31 }
  0x2a   : > { %2270 = vmatprep.subr.bf16.mxu0 %v2455_v33 }
  0x2b   : > { %2167 = vmatmul.mubr.msk.bf16.gmra.mrb[12].mxu0 %vm478_vm0, %v2763_v32  ;;  %2175 = vmatmul.mubr.msk.bf16.gmra.mrb[12].mxu1 %vm478_vm0, %v2763_v32 }
  0x2c   : > { %1034 = vmatprep.mubr.bf16.mxu1 %v2585_v2 }
  0x2d   : > { %2271 = vmatpush3.bf16.msra.mxu0 %v2456_v34 }
  0x2e   : > { %2272 = vmatprep.subr.bf16.mxu0 %v2457_v35 }
  0x31   : > { %2273 = vmatpush3.bf16.msra.mxu0 %v2458_v36 }
  0xe6   : > { %v525_v47 = vpop.f32.mrb[0].mxu0  ;;  %v633_v48 = vpop.f32.mrb[0].mxu1 }
  0xe7   : > { %v526_v49 = vadd.f32 %v525_v47, %v2793_v43  ;;  %v634_v50 = vadd.f32 %v633_v48, %v2796_v44  ;;  %v527_v51 = vpop.f32.mrb[1].mxu0  ;;  %v635_v52 = vpop.f32.mrb[1].mxu1 }
  0xe8   : > { %v528_v53 = vadd.f32 %v527_v51, %v2799_v45  ;;  %v636_v54 = vadd.f32 %v635_v52, %v2802_v46  ;;  %v529_v55 = vpop.f32.mrb[2].mxu0  ;;  %v637_v56 = vpop.f32.mrb[2].mxu1 }
  0xe9   : > { %v672_v57 = vmul.f32 %v634_v50, %v526_v49  ;;  %v530_v58 = vadd.f32 %v529_v55, %v2793_v43  ;;  %v638_v59 = vadd.f32 %v637_v56, %v2796_v44  ;;  %v531_v60 = vpop.f32.mrb[3].mxu0  ;;  %v639_v61 = vpop.f32.mrb[3].mxu1 }
  0xea   : > { %v673_v62 = vmul.f32 %v636_v54, %v528_v53  ;;  %v532_v63 = vadd.f32 %v531_v60, %v2799_v45  ;;  %v640_v0 = vadd.f32 %v639_v61, %v2802_v46 }
  0xeb   : > { %v674_v1 = vmul.f32 %v638_v59, %v530_v58 }
  0xec   : > { %v675_v3 = vmul.f32 %v640_v0, %v532_v63 }
  0xed   : > { %v688_v4 = vpack.c.bf16 %v674_v1, %v672_v57 }
  0xee   : > { %v535_v5 = vpop.f32.mrb[4].mxu0  ;;  %v643_v6 = vpop.f32.mrb[4].mxu1  ;;  %v689_v7 = vpack.c.bf16 %v675_v3, %v673_v62 }
  0xef   : > { %v536_v8 = vadd.f32 %v535_v5, %v2793_v43  ;;  %v644_v9 = vadd.f32 %v643_v6, %v2796_v44  ;;  %v537_v10 = vpop.f32.mrb[5].mxu0  ;;  %v645_v11 = vpop.f32.mrb[5].mxu1 }
  0xf0   : > { %v538_v13 = vadd.f32 %v537_v10, %v2799_v45  ;;  %v646_v14 = vadd.f32 %v645_v11, %v2802_v46  ;;  %v539_v15 = vpop.f32.mrb[6].mxu0  ;;  %v647_v16 = vpop.f32.mrb[6].mxu1  ;;  %856 = vmatprep.mubr.bf16.mxu0 %v689_v7 }
  0xf1   : > { %v676_v17 = vmul.f32 %v644_v9, %v536_v8  ;;  %v540_v18 = vadd.f32 %v539_v15, %v2793_v43  ;;  %v648_v20 = vadd.f32 %v647_v16, %v2796_v44  ;;  %v541_v21 = vpop.f32.mrb[7].mxu0  ;;  %v649_v22 = vpop.f32.mrb[7].mxu1  ;;  %857 = vmatmul.mubr.bf16.vlgmr.msra.gmra.mrb[16].mxu0 %v688_v4 }
  0xf2   : > { %v677_v23 = vmul.f32 %v646_v14, %v538_v13  ;;  %v542_v24 = vadd.f32 %v541_v21, %v2799_v45  ;;  %v650_v25 = vadd.f32 %v649_v22, %v2802_v46  ;;  %v2467_v21 = vld [vmem:[%s3281_s3 + $0x14] ss:$8 sps:$4 sm:$0xff]  }
  0xf3   : > { %v678_v27 = vmul.f32 %v648_v20, %v540_v18  ;;  %v2470_v22 = vld [vmem:[%s3283_s5 + $0x14] ss:$8 sps:$4 sm:$0xff]  }
  0xf4   : > { %v679_v28 = vmul.f32 %v650_v25, %v542_v24  ;;  %v2468_v24 = vld [vmem:[%s3283_s5 + $0x10] ss:$8 sps:$4 sm:$0xff]  }
  0xf5   : > { %v690_v29 = vpack.c.bf16 %v678_v27, %v676_v17 }
  0xf6   : > { %v545_v30 = vpop.f32.mrb[8].mxu0  ;;  %v653_v31 = vpop.f32.mrb[8].mxu1  ;;  %v691_v33 = vpack.c.bf16 %v679_v28, %v677_v23  ;;  %v2465_v23 = vld [vmem:[%s3281_s3 + $0x10] ss:$8 sps:$4 sm:$0xff]  }
  0xf7   : > { %v546_v34 = vadd.f32 %v545_v30, %v2793_v43  ;;  %v654_v35 = vadd.f32 %v653_v31, %v2796_v44  ;;  %v547_v36 = vpop.f32.mrb[9].mxu0  ;;  %v655_v37 = vpop.f32.mrb[9].mxu1 }
  0xf8   : > { %v548_v38 = vadd.f32 %v547_v36, %v2799_v45  ;;  %v656_v39 = vadd.f32 %v655_v37, %v2802_v46  ;;  %v549_v41 = vpop.f32.mrb[10].mxu0  ;;  %v657_v47 = vpop.f32.mrb[10].mxu1  ;;  %864 = vmatprep.mubr.bf16.mxu0 %v691_v33 }
  0xf9   : > { %v680_v48 = vmul.f32 %v654_v35, %v546_v34  ;;  %v550_v49 = vadd.f32 %v549_v41, %v2793_v43  ;;  %v658_v50 = vadd.f32 %v657_v47, %v2796_v44  ;;  %v551_v51 = vpop.f32.mrb[11].mxu0  ;;  %v659_v52 = vpop.f32.mrb[11].mxu1  ;;  %865 = vmatmul.mubr.bf16.gmra.mrb[20].mxu0 %v690_v29 }
  0xfa   : > { %v681_v53 = vmul.f32 %v656_v39, %v548_v38  ;;  %v552_v54 = vadd.f32 %v551_v51, %v2799_v45  ;;  %v660_v55 = vadd.f32 %v659_v52, %v2802_v46 }
  0xfb   : > { %v682_v56 = vmul.f32 %v658_v50, %v550_v49 }
  0xfc   : > { %v683_v57 = vmul.f32 %v660_v55, %v552_v54 }
  0xfd   : > { %v692_v58 = vpack.c.bf16 %v682_v56, %v680_v48 }
  0xfe   : > { %v555_v59 = vpop.f32.mrb[12].mxu0  ;;  %v663_v60 = vpop.f32.mrb[12].mxu1  ;;  %v693_v61 = vpack.c.bf16 %v683_v57, %v681_v53 }
  0xff   : > { %v556_v62 = vadd.f32 %v555_v59, %v2793_v43  ;;  %v664_v63 = vadd.f32 %v663_v60, %v2796_v44  ;;  %v557_v0 = vpop.f32.mrb[13].mxu0  ;;  %v665_v1 = vpop.f32.mrb[13].mxu1 }
 0x100   : > { %v558_v3 = vadd.f32 %v557_v0, %v2799_v45  ;;  %v666_v4 = vadd.f32 %v665_v1, %v2802_v46  ;;  %v559_v5 = vpop.f32.mrb[14].mxu0  ;;  %v667_v6 = vpop.f32.mrb[14].mxu1  ;;  %872 = vmatprep.mubr.bf16.mxu0 %v693_v61 }
 0x101   : > { %v684_v7 = vmul.f32 %v664_v63, %v556_v62  ;;  %v560_v8 = vadd.f32 %v559_v5, %v2793_v43  ;;  %v668_v9 = vadd.f32 %v667_v6, %v2796_v44  ;;  %v561_v10 = vpop.f32.mrb[15].mxu0  ;;  %v669_v11 = vpop.f32.mrb[15].mxu1  ;;  %873 = vmatmul.mubr.bf16.gmra.mrb[24].mxu0 %v692_v58  ;;  %v2459_v43 = vld [vmem:[%s3281_s3] ss:$8 sps:$4 sm:$0xff]   ;;  %v2461_v44 = vld [vmem:[%s3281_s3 + $0x4] ss:$8 sps:$4 sm:$0xff]  }
 0x102   : > { %v685_v13 = vmul.f32 %v666_v4, %v558_v3  ;;  %v562_v14 = vadd.f32 %v561_v10, %v2799_v45  ;;  %v670_v15 = vadd.f32 %v669_v11, %v2802_v46  ;;  %v2462_v45 = vld [vmem:[%s3283_s5] ss:$8 sps:$4 sm:$0xff]   ;;  %v2464_v46 = vld [vmem:[%s3283_s5 + $0x4] ss:$8 sps:$4 sm:$0xff]   ;;  %1110 = vmatprep.subr.bf16.mxu0 %v2461_v44  ;;  %v2476_v10 = vld [vmem:[%s3283_s5 + $0x34] ss:$8 sps:$4 sm:$0xff]  }
 0x103   : > { %v686_v16 = vmul.f32 %v668_v9, %v560_v8  ;;  %1111 = vmatpush1.bf16.msra.mxu0 %v2459_v43  ;;  %1002 = vmatprep.subr.bf16.mxu1 %v2464_v46  ;;  %v2477_v8 = vld [vmem:[%s3284_s6] sm:$0xff]   ;;  %v2478_v11 = vld [vmem:[%s3284_s6 + $0x8] sm:$0xff]  }
 0x104   : > { %v687_v17 = vmul.f32 %v670_v15, %v562_v14  ;;  %1003 = vmatpush1.bf16.msra.mxu1 %v2462_v45  ;;  %1112 = vmatprep.subr.bf16.mxu0 %v2467_v21  ;;  %v2471_v9 = vld [vmem:[%s3283_s5 + $0x20] ss:$8 sps:$4 sm:$0xff]   ;;  %v2479_v14 = vld [vmem:[%s3284_s6 + $0x10] sm:$0xff]   ;;  %v2480_v15 = vld [vmem:[%s3284_s6 + $0x18] sm:$0xff]  }
 0x105   : > { %v694_v18 = vpack.c.bf16 %v686_v16, %v684_v7  ;;  %1004 = vmatprep.subr.bf16.mxu1 %v2470_v22  ;;  %v2473_v7 = vld [vmem:[%s3283_s5 + $0x24] ss:$8 sps:$4 sm:$0xff]  }
 0x106   : > { %v695_v20 = vpack.c.bf16 %v687_v17, %v685_v13  ;;  %v2474_v13 = vld [vmem:[%s3283_s5 + $0x30] ss:$8 sps:$4 sm:$0xff]   ;;  %v2481_v16 = vld [vmem:[%s3285_s7 + $0x40] sm:$0xff]  }
 0x107   : > { %1113 = vmatpush1.bf16.msra.mxu0 %v2465_v23 }
 0x108   : > { %880 = vmatprep.mubr.bf16.mxu0 %v695_v20  ;;  %1005 = vmatpush1.bf16.msra.mxu1 %v2468_v24 }
 0x109   : > { %881 = vmatmul.mubr.bf16.gmra.mrb[28].mxu0 %v694_v18  ;;  %1006 = vmatprep.subr.bf16.mxu1 %v2473_v7 }
 0x10a   : > { %1142 = vmatprep.mubr.bf16.mxu0 %v2585_v2  ;;  %2366 = vmatprep.subr.bf16.mxu0 %v2477_v8 }
 0x10c   : > { %1007 = vmatpush1.bf16.msra.mxu1 %v2471_v9 }
 0x10d   : > { %1008 = vmatprep.subr.bf16.mxu1 %v2476_v10  ;;  %v2493_v10 = vld [vmem:[%s3285_s7 + $0x70] sm:$0xff]  }
 0x110   : > { %1009 = vmatpush1.bf16.msra.mxu1 %v2474_v13 }
 0x111   : > { %2208 = vmatmul.mubr.msk.bf16.vlgmr.msra.gmra.mrb[32].mxu0 %vm478_vm0, %v2700_v12  ;;  %v435_v12 = vld [vmem:[%s3289_s11 + $0x3] ss:$0 sm:$0xff]  ;;  %2298 = vmatprep.subr.bf16.mxu1 %v2481_v16  ;;  %v2495_v16 = vld [vmem:[%s3285_s7 + $0x78] sm:$0xff]  }
 0x112   : > { %1152 = vmatprep.mubr.bf16.mxu0 %v2585_v2  ;;  %2367 = vmatpush3.bf16.msra.mxu0 %v2477_v8 }
 0x113   : > { %2368 = vmatprep.subr.bf16.mxu0 %v2478_v11 }
 0x116   : > { %2369 = vmatpush3.bf16.msra.mxu0 %v2478_v11 }
 0x117   : > { %2370 = vmatprep.subr.bf16.mxu0 %v2479_v14 }
 0x119   : > { %2209 = vmatmul.mubr.msk.bf16.gmra.mrb[36].mxu0 %vm478_vm0, %v2722_v19 }
 0x11a   : > { %1162 = vmatprep.mubr.bf16.mxu0 %v2585_v2  ;;  %2371 = vmatpush3.bf16.msra.mxu0 %v2479_v14 }
 0x11b   : > { %2372 = vmatprep.subr.bf16.mxu0 %v2480_v15 }
 0x11e   : > { %2373 = vmatpush3.bf16.msra.mxu0 %v2480_v15 }
 0x121   : > { %2210 = vmatmul.mubr.msk.bf16.gmra.mrb[40].mxu0 %vm478_vm0, %v2744_v26 }
 0x122   : > { %1172 = vmatprep.mubr.bf16.mxu0 %v2585_v2 }
 0x129   : > { %2211 = vmatmul.mubr.msk.bf16.gmra.mrb[44].mxu0 %vm478_vm0, %v2763_v32 }
 0x1c4   : > { %v2274_v25 = vpop.f32.mrb[16].mxu0 }
 0x1c5   : > { %v2275_v27 = vpop.f32.mrb[17].mxu0 }
 0x1c6   : > { %v2276_v28 = vadd.f32 %v2275_v27, %v2274_v25  ;;  %v2277_v29 = vpop.f32.mrb[18].mxu0 }
 0x1c7   : > { %v2278_v30 = vpop.f32.mrb[19].mxu0 }
 0x1c8   : > { %v2279_v19 = vadd.f32 %v2278_v30, %v2277_v29  ;;  %v2875_v31 = vadd.f32 %v2276_v28, %v435_v12 }
 0x1ca   : > { %v890_v26 = vsel %vm889_vm1, %v2875_v31, -inf  ;;  %v2879_v33 = vadd.f32 %v2279_v19, %v435_v12 }
 0x1cb   : > { %891 = vmax.xlane.f32.xlu0 %v890_v26 }
 0x1cc   : > { %v2280_v32 = vpop.f32.mrb[20].mxu0  ;;  %v893_v37 = vsel %vm889_vm1, %v2879_v33, -inf }
 0x1cd   : > { %v2281_v34 = vpop.f32.mrb[21].mxu0 }
 0x1ce   : > { %v2282_v35 = vadd.f32 %v2281_v34, %v2280_v32  ;;  %v2283_v36 = vpop.f32.mrb[22].mxu0 }
 0x1cf   : > { %v2284_v38 = vpop.f32.mrb[23].mxu0  ;;  %894 = vmax.xlane.f32.xlu0 %v893_v37 }
 0x1d0   : > { %v2285_v39 = vadd.f32 %v2284_v38, %v2283_v36  ;;  %v2883_v41 = vadd.f32 %v2282_v35, %v435_v12 }
 0x1d2   : > { %v896_v47 = vsel %vm889_vm1, %v2883_v41, -inf  ;;  %v2887_v48 = vadd.f32 %v2285_v39, %v435_v12  ;;  %v2482_v39 = vld [vmem:[%s3285_s7] sm:$0xff]  }
 0x1d3   : > { %897 = vmax.xlane.f32.xlu1 %v896_v47  ;;  %v2483_v47 = vld [vmem:[%s3285_s7 + $0x48] sm:$0xff]  }
 0x1d4   : > { %v2286_v49 = vpop.f32.mrb[24].mxu0  ;;  %v899_v53 = vsel %vm889_vm1, %v2887_v48, -inf }
 0x1d5   : > { %v2287_v50 = vpop.f32.mrb[25].mxu0 }
 0x1d6   : > { %v2288_v51 = vadd.f32 %v2287_v50, %v2286_v49  ;;  %v2289_v52 = vpop.f32.mrb[26].mxu0  ;;  %v2484_v49 = vld [vmem:[%s3285_s7 + $0x8] sm:$0xff]  }
 0x1d7   : > { %v2290_v54 = vpop.f32.mrb[27].mxu0  ;;  %900 = vmax.xlane.f32.xlu1 %v899_v53 }
 0x1d8   : > { %v2291_v55 = vadd.f32 %v2290_v54, %v2289_v52  ;;  %v2891_v56 = vadd.f32 %v2288_v51, %v435_v12  ;;  %v2485_v51 = vld [vmem:[%s3285_s7 + $0x50] sm:$0xff]  }
 0x1da   : > { %v902_v57 = vsel %vm889_vm1, %v2891_v56, -inf  ;;  %v2895_v58 = vadd.f32 %v2291_v55, %v435_v12 }
 0x1db   : > { %903 = vmax.xlane.f32.xlu0 %v902_v57 }
 0x1dc   : > { %v2292_v59 = vpop.f32.mrb[28].mxu0  ;;  %v905_v60 = vsel %vm889_vm1, %v2895_v58, -inf }
 0x1dd   : > { %v2293_v61 = vpop.f32.mrb[29].mxu0  ;;  %906 = vmax.xlane.f32.xlu1 %v905_v60  ;;  %v2487_v60 = vld [vmem:[%s3285_s7 + $0x58] sm:$0xff]  }
 0x1de   : > { %v2294_v62 = vadd.f32 %v2293_v61, %v2292_v59  ;;  %v2295_v63 = vpop.f32.mrb[30].mxu0 }
 0x1df   : > { %v2296_v0 = vpop.f32.mrb[31].mxu0 }
 0x1e0   : > { %v2297_v1 = vadd.f32 %v2296_v0, %v2295_v63  ;;  %v2899_v3 = vadd.f32 %v2294_v62, %v435_v12  ;;  %v2488_v62 = vld [vmem:[%s3285_s7 + $0x18] sm:$0xff]   ;;  %v2489_v0 = vld [vmem:[%s3285_s7 + $0x60] sm:$0xff]  }
 0x1e2   : > { %v908_v4 = vsel %vm889_vm1, %v2899_v3, -inf  ;;  %v2903_v5 = vadd.f32 %v2297_v1, %v435_v12 }
 0x1e3   : > { %909 = vmax.xlane.f32.xlu0 %v908_v4  ;;  %v2490_v4 = vld [vmem:[%s3285_s7 + $0x20] sm:$0xff]  }
 0x1e4   : > { %v911_v6 = vsel %vm889_vm1, %v2903_v5, -inf  ;;  %v2934_v17 = vpop.f32.mrb[32].mxu0 }
 0x1e5   : > { %912 = vmax.xlane.f32.xlu1 %v911_v6  ;;  %v2936_v18 = vpop.f32.mrb[33].mxu0  ;;  %v2492_v6 = vld [vmem:[%s3285_s7 + $0x28] sm:$0xff]  }
 0x1e6   : > { %v2938_v20 = vpop.f32.mrb[34].mxu0 }
 0x1e7   : > { %v2940_v43 = vpop.f32.mrb[35].mxu0 }
 0x1ec   : > { %v2942_v44 = vpop.f32.mrb[36].mxu0 }
 0x1ed   : > { %v2944_v45 = vpop.f32.mrb[37].mxu0 }
 0x1ee   : > { %v2946_v46 = vpop.f32.mrb[38].mxu0 }
 0x1ef   : > { %v2948_v21 = vpop.f32.mrb[39].mxu0 }
 0x1f4   : > { %v1164_v11 = vpop.f32.mrb[40].mxu0 }
 0x1f5   : > { %v1166_v13 = vpop.f32.mrb[41].mxu0 }
 0x1f6   : > { %v1168_v14 = vpop.f32.mrb[42].mxu0 }
 0x1f7   : > { %v1170_v15 = vpop.f32.mrb[43].mxu0 }
 0x258   : > { %v892_v22 = vpop.xlane.xlu0 %891 }
 0x259   : > { %v914_v23 = vsub.f32 %v2875_v31, %v892_v22  ;;  %v1174_v22 = vpop.f32.mrb[44].mxu0 }
 0x25b   : > { %v922_v24 = vmul.f32 1.442695, %v914_v23  ;;  %v2496_v23 = vld [vmem:[%s3285_s7 + $0x38] sm:$0xff]  }
 0x25c   : > { %v895_v25 = vpop.xlane.xlu0 %894 }
 0x25d   : > { %v915_v27 = vsub.f32 %v2879_v33, %v895_v25  ;;  %2505 = vpow2.f32 %v922_v24  ;;  %v1176_v24 = vpop.f32.mrb[45].mxu0 }
 0x25e   : > { %v3014_v25 = vpop.f32.mrb[46].mxu0 }
 0x25f   : > { %v924_v12 = vmul.f32 1.442695, %v915_v27  ;;  %v3016_v27 = vpop.f32.mrb[47].mxu0 }
 0x260   : > { %v898_v28 = vpop.xlane.xlu1 %897 }
 0x261   : > { %2507 = vpow2.f32 %v924_v12  ;;  %v916_v29 = vsub.f32 %v2883_v41, %v898_v28  ;;  %v2497_v12 = vld [vmem:[%s3286_s8] sm:$0xff]  }
 0x262   : > { %v2159_v28 = vld [vmem:[%s3289_s11 + $0x2] ss:$8 sm:$0x3] }
 0x263   : > { %v926_v30 = vmul.f32 1.442695, %v916_v29  ;;  %v1083_v29 = vrot.slane %v2159_v28, %v2785_v40 }
 0x264   : > { %v901_v19 = vpop.xlane.xlu1 %900 }
 0x265   : > { %v917_v26 = vsub.f32 %v2887_v48, %v901_v19  ;;  %2509 = vpow2.f32 %v926_v30  ;;  %v3026_v30 = vrot.slane %v2159_v28, %v2790_v42  ;;  %v1145_v19 = vadd.f32 %v2934_v17, %v1083_v29 }
 0x266   : > { %v1155_v42 = vadd.f32 %v2942_v44, %v1083_v29 }
 0x267   : > { %v928_v32 = vmul.f32 1.442695, %v917_v26  ;;  %v2506_v35 = vpop.eup %2505  ;;  %v1147_v26 = vadd.f32 %v2936_v18, %v3026_v30  ;;  %v1157_v17 = vadd.f32 %v2944_v45, %v3026_v30 }
 0x268   : > { %v904_v34 = vpop.xlane.xlu0 %903 }
 0x269   : > { %2511 = vpow2.f32 %v928_v32  ;;  %v918_v31 = vsub.f32 %v2891_v56, %v904_v34  ;;  %v1149_v34 = vadd.f32 %v2938_v20, %v1083_v29 }
 0x26a   : > { %v907_v36 = vpop.xlane.xlu1 %906 }
 0x26b   : > { %v2508_v37 = vpop.eup %2507  ;;  %v930_v33 = vmul.f32 1.442695, %v918_v31  ;;  %v919_v38 = vsub.f32 %v2895_v58, %v907_v36  ;;  %v2486_v58 = vld [vmem:[%s3285_s7 + $0x10] sm:$0xff]   ;;  %v1151_v36 = vadd.f32 %v2940_v43, %v3026_v30 }
 0x26c   : > { %v938_v41 = vpack.c.bf16 %v2508_v37, %v2506_v35 }
 0x26d   : > { %v932_v48 = vmul.f32 1.442695, %v919_v38  ;;  %2513 = vpow2.f32 %v930_v33 }
 0x26e   : > { %2200 = vmatmul.mubr.msk.bf16.vlgmr.msra.gmra.mrb[16].mxu1 %vm889_vm1, %v938_v41  ;;  %2374 = vmatprep.mubr.msk.bf16.mxu0 %vm889_vm1, %v938_v41 }
 0x26f   : > { %2515 = vpow2.f32 %v932_v48  ;;  %1044 = vmatprep.mubr.bf16.mxu1 %v2585_v2  ;;  %2299 = vmatpush3.bf16.msra.mxu1 %v2482_v39  ;;  %v2510_v53 = vpop.eup %2509  ;;  %v1159_v48 = vadd.f32 %v2946_v46, %v1083_v29 }
 0x270   : > { %v910_v50 = vpop.xlane.xlu0 %909  ;;  %2300 = vmatprep.subr.bf16.mxu1 %v2483_v47 }
 0x271   : > { %v920_v52 = vsub.f32 %v2899_v3, %v910_v50 }
 0x272   : > { %v913_v54 = vpop.xlane.xlu1 %912 }
 0x273   : > { %v2512_v55 = vpop.eup %2511  ;;  %v934_v56 = vmul.f32 1.442695, %v920_v52  ;;  %v921_v57 = vsub.f32 %v2903_v5, %v913_v54  ;;  %2301 = vmatpush3.bf16.msra.mxu1 %v2484_v49  ;;  %v2491_v5 = vld [vmem:[%s3285_s7 + $0x68] sm:$0xff]  }
 0x274   : > { %v939_v59 = vpack.c.bf16 %v2512_v55, %v2510_v53  ;;  %2302 = vmatprep.subr.bf16.mxu1 %v2485_v51  ;;  %v1161_v51 = vadd.f32 %v2948_v21, %v3026_v30  ;;  %v1171_v21 = vadd.f32 %v1170_v15, %v3026_v30 }
 0x275   : > { %v936_v61 = vmul.f32 1.442695, %v921_v57  ;;  %2517 = vpow2.f32 %v934_v56  ;;  %v1165_v57 = vadd.f32 %v1164_v11, %v1083_v29 }
 0x276   : > { %2201 = vmatmul.mubr.msk.bf16.gmra.mrb[20].mxu1 %vm889_vm1, %v939_v59  ;;  %2375 = vmatmul.mubr.msk.bf16.vlgmr.msra.gmra.mrb[48].mxu0 %vm889_vm1, %v939_v59  ;;  %v1167_v59 = vadd.f32 %v1166_v13, %v3026_v30 }
 0x277   : > { %2519 = vpow2.f32 %v936_v61  ;;  %1054 = vmatprep.mubr.bf16.mxu1 %v2585_v2  ;;  %2303 = vmatpush3.bf16.msra.mxu1 %v2486_v58  ;;  %v2514_v63 = vpop.eup %2513  ;;  %v1169_v61 = vadd.f32 %v1168_v14, %v1083_v29  ;;  %v1179_v14 = vadd.f32 %v3014_v25, %v1083_v29  ;;  %v2498_v25 = vld [vmem:[%s3286_s8 + $0x8] sm:$0xff]  }
 0x278   : > { %2304 = vmatprep.subr.bf16.mxu1 %v2487_v60 }
 0x279   : > { %v2516_v1 = vpop.eup %2515 }
 0x27a   : > { %v940_v3 = vpack.c.bf16 %v2516_v1, %v2514_v63 }
 0x27b   : > { %2305 = vmatpush3.bf16.msra.mxu1 %v2488_v62 }
 0x27c   : > { %2378 = vmatprep.mubr.msk.bf16.mxu0 %vm889_vm1, %v940_v3  ;;  %2306 = vmatprep.subr.bf16.mxu1 %v2489_v0 }
 0x27e   : > { %2202 = vmatmul.mubr.msk.bf16.gmra.mrb[24].mxu1 %vm889_vm1, %v940_v3 }
 0x27f   : > { %1064 = vmatprep.mubr.bf16.mxu1 %v2585_v2  ;;  %2307 = vmatpush3.bf16.msra.mxu1 %v2490_v4  ;;  %v2518_v7 = vpop.eup %2517  ;;  %v2494_v2 = vld [vmem:[%s3285_s7 + $0x30] sm:$0xff]  }
 0x280   : > { %2308 = vmatprep.subr.bf16.mxu1 %v2491_v5 }
 0x281   : > { %v2520_v8 = vpop.eup %2519 }
 0x282   : > { %v941_v9 = vpack.c.bf16 %v2520_v8, %v2518_v7  ;;  %v1177_v8 = vadd.f32 %v1176_v24, %v3026_v30 }
 0x283   : > { %2309 = vmatpush3.bf16.msra.mxu1 %v2492_v6  ;;  %v1175_v6 = vadd.f32 %v1174_v22, %v1083_v29 }
 0x284   : > { %2379 = vmatmul.mubr.msk.bf16.gmra.mrb[52].mxu0 %vm889_vm1, %v941_v9  ;;  %2310 = vmatprep.subr.bf16.mxu1 %v2493_v10 }
 0x286   : > { %2203 = vmatmul.mubr.msk.bf16.gmra.mrb[28].mxu1 %vm889_vm1, %v941_v9 }
 0x287   : > { %2311 = vmatpush3.bf16.msra.mxu1 %v2494_v2 }
 0x288   : > { %2312 = vmatprep.subr.bf16.mxu1 %v2495_v16 }
 0x28b   : > { %2313 = vmatpush3.bf16.msra.mxu1 %v2496_v23 }
 0x28c   : > { %2382 = vmatprep.subr.bf16.mxu1 %v2497_v12 }
 0x341   : > { %v1036_v32 = vpop.f32.mrb[16].mxu1 }
 0x342   : > { %v1183_v31 = vmul.f32 %v1145_v19, %v1036_v32  ;;  %v1038_v35 = vpop.f32.mrb[17].mxu1 }
 0x343   : > { %v1184_v37 = vmul.f32 %v1147_v26, %v1038_v35  ;;  %v1040_v33 = vpop.f32.mrb[18].mxu1 }
 0x344   : > { %v1185_v38 = vmul.f32 %v1149_v34, %v1040_v33  ;;  %v1042_v40 = vpop.f32.mrb[19].mxu1 }
 0x345   : > { %v1186_v39 = vmul.f32 %v1151_v36, %v1042_v40 }
 0x346   : > { %v1199_v41 = vpack.c.bf16 %v1185_v38, %v1183_v31 }
 0x347   : > { %v1200_v18 = vpack.c.bf16 %v1186_v39, %v1184_v37 }
 0x349   : > { %v1046_v47 = vpop.f32.mrb[20].mxu1  ;;  %1367 = vmatprep.mubr.bf16.mxu1 %v1200_v18  ;;  %v2376_v20 = vpop.f32.mrb[48].mxu0 }
 0x34a   : > { %v1187_v49 = vmul.f32 %v1155_v42, %v1046_v47  ;;  %v1048_v50 = vpop.f32.mrb[21].mxu1  ;;  %1368 = vmatmul.mubr.bf16.vlgmr.msra.gmra.mrb[32].mxu1 %v1199_v41  ;;  %v1466_v43 = vpop.f32.mrb[49].mxu0 }
 0x34b   : > { %v1188_v52 = vmul.f32 %v1157_v17, %v1048_v50  ;;  %v1050_v53 = vpop.f32.mrb[22].mxu1  ;;  %v2377_v44 = vpop.f32.mrb[50].mxu0  ;;  %2383 = vmatpush3.bf16.msra.mxu1 %v2497_v12  ;;  %v1181_v12 = vadd.f32 %v3016_v27, %v3026_v30  ;;  %2521 = vrcp.f32 %v1466_v43 }
 0x34c   : > { %v1189_v54 = vmul.f32 %v1159_v48, %v1050_v53  ;;  %v1052_v55 = vpop.f32.mrb[23].mxu1  ;;  %v1469_v45 = vpop.f32.mrb[51].mxu0  ;;  %2384 = vmatprep.subr.bf16.mxu1 %v2498_v25 }
 0x34d   : > { %v1190_v56 = vmul.f32 %v1161_v51, %v1052_v55  ;;  %2523 = vrcp.f32 %v1469_v45 }
 0x34e   : > { %v1201_v58 = vpack.c.bf16 %v1189_v54, %v1187_v49  ;;  %2525 = vrcp.f32 %v2376_v20 }
 0x34f   : > { %v1202_v46 = vpack.c.bf16 %v1190_v56, %v1188_v52  ;;  %2385 = vmatpush3.bf16.msra.mxu1 %v2498_v25  ;;  %2527 = vrcp.f32 %v2377_v44 }
 0x351   : > { %v1056_v60 = vpop.f32.mrb[24].mxu1  ;;  %1375 = vmatprep.mubr.bf16.mxu1 %v1202_v46 }
 0x352   : > { %v1191_v62 = vmul.f32 %v1165_v57, %v1056_v60  ;;  %v1058_v63 = vpop.f32.mrb[25].mxu1  ;;  %1376 = vmatmul.mubr.bf16.gmra.mrb[36].mxu1 %v1201_v58 }
 0x353   : > { %v1192_v0 = vmul.f32 %v1167_v59, %v1058_v63  ;;  %v1060_v1 = vpop.f32.mrb[26].mxu1 }
 0x354   : > { %v1193_v3 = vmul.f32 %v1169_v61, %v1060_v1  ;;  %v1062_v4 = vpop.f32.mrb[27].mxu1 }
 0x355   : > { %v1194_v5 = vmul.f32 %v1171_v21, %v1062_v4  ;;  %v2522_v35 = vpop.eup %2521 }
 0x356   : > { %v1203_v7 = vpack.c.bf16 %v1193_v3, %v1191_v62 }
 0x357   : > { %v1204_v9 = vpack.c.bf16 %v1194_v5, %v1192_v0  ;;  %v2380_v10 = vpop.f32.mrb[52].mxu0  ;;  %v2524_v38 = vpop.eup %2523 }
 0x358   : > { %v1482_v11 = vpop.f32.mrb[53].mxu0  ;;  %v2526_v47 = vpop.eup %2525 }
 0x359   : > { %v1066_v2 = vpop.f32.mrb[28].mxu1  ;;  %1383 = vmatprep.mubr.bf16.mxu1 %v1204_v9  ;;  %v2381_v13 = vpop.f32.mrb[54].mxu0  ;;  %2529 = vrcp.f32 %v1482_v11 }
 0x35a   : > { %v1195_v16 = vmul.f32 %v1175_v6, %v1066_v2  ;;  %v1068_v23 = vpop.f32.mrb[29].mxu1  ;;  %1384 = vmatmul.mubr.bf16.gmra.mrb[40].mxu1 %v1203_v7  ;;  %v1485_v15 = vpop.f32.mrb[55].mxu0  ;;  %v436_v7 = vld [vmem:[%s3289_s11 + $0x4] ss:$0 sm:$0xff] }
 0x35b   : > { %v1196_v28 = vmul.f32 %v1177_v8, %v1068_v23  ;;  %v1070_v22 = vpop.f32.mrb[30].mxu1  ;;  %2531 = vrcp.f32 %v1485_v15  ;;  %v2528_v50 = vpop.eup %2527  ;;  %v2569_v23 = vld [vmem:[%s2696_s29] sm:$0xff] }
 0x35c   : > { %v1197_v19 = vmul.f32 %v1179_v14, %v1070_v22  ;;  %v1072_v26 = vpop.f32.mrb[31].mxu1  ;;  %2533 = vrcp.f32 %v2380_v10 }
 0x35d   : > { %v1198_v24 = vmul.f32 %v1181_v12, %v1072_v26  ;;  %2535 = vrcp.f32 %v2381_v13 }
 0x35e   : > { %v1205_v32 = vpack.c.bf16 %v1197_v19, %v1195_v16  ;;  %v2571_v19 = vld [vmem:[%s2696_s29 + $0x10] sm:$0xff] }
 0x35f   : > { %v1206_v34 = vpack.c.bf16 %v1198_v24, %v1196_v28  ;;  %v2570_v28 = vld [vmem:[%s2696_s29 + $0x8] sm:$0xff] }
 0x361   : > { %1391 = vmatprep.mubr.bf16.mxu1 %v1206_v34 }
 0x362   : > { %1392 = vmatmul.mubr.bf16.gmra.mrb[44].mxu1 %v1205_v32  ;;  %v2572_v32 = vld [vmem:[%s2696_s29 + $0x18] sm:$0xff] }
 0x363   : > { %v2530_v55 = vpop.eup %2529 }
 0x365   : > { %v2532_v58 = vpop.eup %2531 }
 0x366   : > { %v2534_v21 = vpop.eup %2533 }
 0x367   : > { %v2536_v4 = vpop.eup %2535 }
 0x41d   : > { %v2314_v29 = vpop.f32.mrb[32].mxu1 }
 0x41e   : > { %v2315_v27 = vpop.f32.mrb[33].mxu1 }
 0x41f   : > { %v2316_v30 = vadd.f32 %v2315_v27, %v2314_v29  ;;  %v2317_v31 = vpop.f32.mrb[34].mxu1 }
 0x420   : > { %v2318_v36 = vpop.f32.mrb[35].mxu1 }
 0x421   : > { %v1505_v37 = vmul.f32 %v2522_v35, %v2316_v30  ;;  %v2319_v33 = vadd.f32 %v2318_v36, %v2317_v31 }
 0x423   : > { %v1506_v40 = vmul.f32 %v2524_v38, %v2319_v33 }
 0x425   : > { %v1513_v39 = vpack.c.bf16 %v1506_v40, %v1505_v37  ;;  %v2320_v42 = vpop.f32.mrb[36].mxu1  ;;  %v2573_v40 = vld [vmem:[%s2696_s29 + $0x20] sm:$0xff] }
 0x426   : > { %v2321_v41 = vpop.f32.mrb[37].mxu1 }
 0x427   : > { %v2322_v17 = vadd.f32 %v2321_v41, %v2320_v42  ;;  %v2323_v18 = vpop.f32.mrb[38].mxu1  ;;  %2386 = vmatprep.mubr.msk.bf16.mxu1 %vm478_vm0, %v1513_v39  ;;  %v2574_v41 = vld [vmem:[%s2696_s29 + $0x28] sm:$0xff] }
 0x428   : > { %v2324_v20 = vpop.f32.mrb[39].mxu1 }
 0x429   : > { %v1507_v48 = vmul.f32 %v2526_v47, %v2322_v17  ;;  %v2325_v49 = vadd.f32 %v2324_v20, %v2323_v18  ;;  %v2575_v18 = vld [vmem:[%s2696_s29 + $0x30] sm:$0xff] }
 0x42b   : > { %v1508_v43 = vmul.f32 %v2528_v50, %v2325_v49 }
 0x42d   : > { %v1514_v51 = vpack.c.bf16 %v1508_v43, %v1507_v48  ;;  %v2326_v52 = vpop.f32.mrb[40].mxu1  ;;  %v2576_v48 = vld [vmem:[%s2696_s29 + $0x38] sm:$0xff] }
 0x42e   : > { %v2327_v53 = vpop.f32.mrb[41].mxu1 }
 0x42f   : > { %v2328_v44 = vadd.f32 %v2327_v53, %v2326_v52  ;;  %v2329_v54 = vpop.f32.mrb[42].mxu1  ;;  %2387 = vmatmul.mubr.msk.bf16.vlgmr.msra.gmra.mrb[48].mxu1 %vm478_vm0, %v1514_v51 }
 0x430   : > { %v2330_v45 = vpop.f32.mrb[43].mxu1 }
 0x431   : > { %v1509_v56 = vmul.f32 %v2530_v55, %v2328_v44  ;;  %v2331_v57 = vadd.f32 %v2330_v45, %v2329_v54 }
 0x433   : > { %v1510_v59 = vmul.f32 %v2532_v58, %v2331_v57 }
 0x435   : > { %v1515_v46 = vpack.c.bf16 %v1510_v59, %v1509_v56  ;;  %v2332_v60 = vpop.f32.mrb[44].mxu1 }
 0x436   : > { %v2333_v61 = vpop.f32.mrb[45].mxu1 }
 0x437   : > { %v2334_v62 = vadd.f32 %v2333_v61, %v2332_v60  ;;  %v2335_v63 = vpop.f32.mrb[46].mxu1  ;;  %2390 = vmatprep.mubr.msk.bf16.mxu1 %vm478_vm0, %v1515_v46 }
 0x438   : > { %v2336_v0 = vpop.f32.mrb[47].mxu1 }
 0x439   : > { %v1511_v1 = vmul.f32 %v2534_v21, %v2334_v62  ;;  %v2337_v3 = vadd.f32 %v2336_v0, %v2335_v63 }
 0x43b   : > { %v1512_v5 = vmul.f32 %v2536_v4, %v2337_v3 }
 0x43d   : > { %v1516_v6 = vpack.c.bf16 %v1512_v5, %v1511_v1 }
 0x43f   : > { %2391 = vmatmul.mubr.msk.bf16.gmra.mrb[52].mxu1 %vm478_vm0, %v1516_v6 }
 0x502   : > { %v2388_v8 = vpop.f32.mrb[48].mxu1 }
 0x503   : > { %v1579_v9 = vpop.f32.mrb[49].mxu1  ;;  %v1588_v10 = vadd.f32 %v2388_v8, %v436_v7 }
 0x504   : > { %v1580_v11 = vadd.f32 %v1579_v9, %v436_v7  ;;  %v2389_v2 = vpop.f32.mrb[50].mxu1 }
 0x505   : > { %v1582_v13 = vpop.f32.mrb[51].mxu1  ;;  %v1591_v14 = vadd.f32 %v2389_v2, %v436_v7  ;;  %v1612_v26 = vadd.f32 %v2571_v19, %v1588_v10 }
 0x506   : > { %v1583_v16 = vadd.f32 %v1582_v13, %v436_v7  ;;  %v1610_v15 = vadd.f32 %v2569_v23, %v1580_v11 }
 0x507   : > { %v1613_v34 = vadd.f32 %v2572_v32, %v1591_v14  ;;  %v1624_v25 = vsel %vm478_vm0, %v1612_v26, 0.0  ;;  %v2499_v32 = vld [vmem:[%s3287_s9] sm:$0xff]  }
 0x508   : > { %v1618_v12 = vsel %vm478_vm0, %v1610_v15, 0.0  ;;  %v1611_v22 = vadd.f32 %v2570_v28, %v1583_v16  ;;  %2394 = vmatprep.subr.bf16.mxu0 %v2499_v32 }
 0x509   : > { %1619 = vadd.xlane.f32.xlu0 %v1618_v12  ;;  %v1627_v29 = vsel %vm478_vm0, %v1613_v34, 0.0  ;;  %2395 = vmatpush3.bf16.msra.mxu0 %v2499_v32 }
 0x50a   : > { %v1621_v24 = vsel %vm478_vm0, %v1611_v22, 0.0 }
 0x50b   : > { %1622 = vadd.xlane.f32.xlu1 %v1621_v24 }
 0x50d   : > { %1625 = vadd.xlane.f32.xlu0 %v1624_v25  ;;  %v2501_v25 = vld [vmem:[%s3288_s10] sm:$0xff]  }
 0x50e   : > { %2406 = vmatprep.subr.bf16.mxu1 %v2501_v25 }
 0x50f   : > { %1628 = vadd.xlane.f32.xlu1 %v1627_v29  ;;  %v2502_v29 = vld [vmem:[%s3288_s10 + $0x8] sm:$0xff]   ;;  %2407 = vmatpush3.bf16.msra.mxu1 %v2501_v25 }
 0x510   : > { %2408 = vmatprep.subr.bf16.mxu1 %v2502_v29 }
 0x512   : > { %v2392_v27 = vpop.f32.mrb[52].mxu1 }
 0x513   : > { %v1595_v30 = vpop.f32.mrb[53].mxu1  ;;  %v1604_v31 = vadd.f32 %v2392_v27, %v436_v7  ;;  %2409 = vmatpush3.bf16.msra.mxu1 %v2502_v29  ;;  %v2504_v29 = vld [vmem:[%s3288_s10 + $0x18] sm:$0xff]  }
 0x514   : > { %v1596_v35 = vadd.f32 %v1595_v30, %v436_v7  ;;  %v2393_v36 = vpop.f32.mrb[54].mxu1 }
 0x515   : > { %v1598_v37 = vpop.f32.mrb[55].mxu1  ;;  %v1607_v33 = vadd.f32 %v2393_v36, %v436_v7  ;;  %v1616_v47 = vadd.f32 %v2575_v18, %v1604_v31  ;;  %v437_v18 = vld [vmem:[%s3289_s11 + $0x5] ss:$0 sm:$0xff] }
 0x516   : > { %v1599_v38 = vadd.f32 %v1598_v37, %v436_v7  ;;  %v1614_v39 = vadd.f32 %v2573_v40, %v1596_v35 }
 0x517   : > { %v1617_v49 = vadd.f32 %v2576_v48, %v1607_v33  ;;  %v1636_v50 = vsel %vm478_vm0, %v1616_v47, 0.0 }
 0x518   : > { %v1630_v42 = vsel %vm478_vm0, %v1614_v39, 0.0  ;;  %v1615_v17 = vadd.f32 %v2574_v41, %v1599_v38 }
 0x519   : > { %1631 = vadd.xlane.f32.xlu0 %v1630_v42  ;;  %v1639_v43 = vsel %vm478_vm0, %v1617_v49, 0.0 }
 0x51a   : > { %v1633_v20 = vsel %vm478_vm0, %v1615_v17, 0.0 }
 0x51b   : > { %1634 = vadd.xlane.f32.xlu1 %v1633_v20 }
 0x51d   : > { %1637 = vadd.xlane.f32.xlu0 %v1636_v50 }
 0x51f   : > { %1640 = vadd.xlane.f32.xlu1 %v1639_v43 }
 0x596   : > { %v1620_v51 = vpop.xlane.xlu0 %1619 }
 0x597   : > { %v1643_v52 = vmul.f32 0.03125, %v1620_v51 }
 0x598   : > { %v1623_v53 = vpop.xlane.xlu1 %1622 }
 0x599   : > { %v3072_v44 = vsub.f32 %v1610_v15, %v1643_v52  ;;  %v1644_v54 = vmul.f32 0.03125, %v1623_v53  ;;  %v438_v53 = vld [vmem:[%s3289_s11 + $0x6] ss:$0 sm:$0xff] }
 0x59a   : > { %v1626_v55 = vpop.xlane.xlu0 %1625 }
 0x59b   : > { %v3074_v45 = vsub.f32 %v1611_v22, %v1644_v54  ;;  %v1645_v56 = vmul.f32 0.03125, %v1626_v55  ;;  %v1659_v57 = vmul.f32 %v3072_v44, %v3072_v44 }
 0x59c   : > { %v1629_v58 = vpop.xlane.xlu1 %1628 }
 0x59d   : > { %v3078_v59 = vsub.f32 %v1612_v26, %v1645_v56  ;;  %v1646_v46 = vmul.f32 0.03125, %v1629_v58  ;;  %v1667_v60 = vsel %vm478_vm0, %v1659_v57, 0.0  ;;  %v1660_v61 = vmul.f32 %v3074_v45, %v3074_v45 }
 0x59e   : > { %1668 = vadd.xlane.f32.xlu0 %v1667_v60 }
 0x59f   : > { %v3083_v62 = vsub.f32 %v1613_v34, %v1646_v46  ;;  %v1670_v63 = vsel %vm478_vm0, %v1660_v61, 0.0  ;;  %v1661_v21 = vmul.f32 %v3078_v59, %v3078_v59  ;;  %v2500_v34 = vld [vmem:[%s3287_s9 + $0x8] sm:$0xff]  }
 0x5a0   : > { %1671 = vadd.xlane.f32.xlu1 %v1670_v63  ;;  %2396 = vmatprep.subr.bf16.mxu0 %v2500_v34 }
 0x5a1   : > { %v1673_v0 = vsel %vm478_vm0, %v1661_v21, 0.0  ;;  %v1662_v1 = vmul.f32 %v3083_v62, %v3083_v62  ;;  %2397 = vmatpush3.bf16.msra.mxu0 %v2500_v34 }
 0x5a2   : > { %1674 = vadd.xlane.f32.xlu0 %v1673_v0 }
 0x5a3   : > { %v1676_v3 = vsel %vm478_vm0, %v1662_v1, 0.0 }
 0x5a4   : > { %1677 = vadd.xlane.f32.xlu1 %v1676_v3 }
 0x5a6   : > { %v1632_v4 = vpop.xlane.xlu0 %1631 }
 0x5a7   : > { %v1647_v5 = vmul.f32 0.03125, %v1632_v4 }
 0x5a8   : > { %v1635_v6 = vpop.xlane.xlu1 %1634 }
 0x5a9   : > { %v3092_v7 = vsub.f32 %v1614_v39, %v1647_v5  ;;  %v1648_v8 = vmul.f32 0.03125, %v1635_v6 }
 0x5aa   : > { %v1638_v9 = vpop.xlane.xlu0 %1637 }
 0x5ab   : > { %v3094_v10 = vsub.f32 %v1615_v17, %v1648_v8  ;;  %v1649_v11 = vmul.f32 0.03125, %v1638_v9  ;;  %v1663_v2 = vmul.f32 %v3092_v7, %v3092_v7 }
 0x5ac   : > { %v1641_v13 = vpop.xlane.xlu1 %1640 }
 0x5ad   : > { %v3098_v14 = vsub.f32 %v1616_v47, %v1649_v11  ;;  %v1650_v16 = vmul.f32 0.03125, %v1641_v13  ;;  %v1679_v23 = vsel %vm478_vm0, %v1663_v2, 0.0  ;;  %v1664_v15 = vmul.f32 %v3094_v10, %v3094_v10 }
 0x5ae   : > { %1680 = vadd.xlane.f32.xlu0 %v1679_v23 }
 0x5af   : > { %v3103_v12 = vsub.f32 %v1617_v49, %v1650_v16  ;;  %v1682_v28 = vsel %vm478_vm0, %v1664_v15, 0.0  ;;  %v1665_v22 = vmul.f32 %v3098_v14, %v3098_v14 }
 0x5b0   : > { %1683 = vadd.xlane.f32.xlu1 %v1682_v28 }
 0x5b1   : > { %v1685_v19 = vsel %vm478_vm0, %v1665_v22, 0.0  ;;  %v1666_v26 = vmul.f32 %v3103_v12, %v3103_v12 }
 0x5b2   : > { %1686 = vadd.xlane.f32.xlu0 %v1685_v19 }
 0x5b3   : > { %v1688_v24 = vsel %vm478_vm0, %v1666_v26, 0.0 }
 0x5b4   : > { %1689 = vadd.xlane.f32.xlu1 %v1688_v24 }
 0x62b   : > { %v1669_v27 = vpop.xlane.xlu0 %1668 }
 0x62c   : > { %v1691_v30 = vmul.f32 0.03125, %v1669_v27  ;;  %v439_v27 = vld [vmem:[%s3289_s11 + $0x7] ss:$0 sm:$0xff] }
 0x62d   : > { %v1672_v31 = vpop.xlane.xlu1 %1671 }
 0x62e   : > { %v1699_v35 = vadd.f32 1e-05, %v1691_v30  ;;  %v1692_v36 = vmul.f32 0.03125, %v1672_v31 }
 0x62f   : > { %v1675_v37 = vpop.xlane.xlu0 %1674 }
 0x630   : > { %2537 = vrsqrt.f32 %v1699_v35  ;;  %v1700_v33 = vadd.f32 1e-05, %v1692_v36  ;;  %v1693_v38 = vmul.f32 0.03125, %v1675_v37 }
 0x631   : > { %v1678_v40 = vpop.xlane.xlu1 %1677 }
 0x632   : > { %2539 = vrsqrt.f32 %v1700_v33  ;;  %v1701_v39 = vadd.f32 1e-05, %v1693_v38  ;;  %v1694_v42 = vmul.f32 0.03125, %v1678_v40 }
 0x634   : > { %2541 = vrsqrt.f32 %v1701_v39  ;;  %v1702_v41 = vadd.f32 1e-05, %v1694_v42 }
 0x636   : > { %2543 = vrsqrt.f32 %v1702_v41 }
 0x63a   : > { %v2538_v17 = vpop.eup %2537 }
 0x63b   : > { %v1715_v47 = vmul.f32 %v2538_v17, %v3072_v44  ;;  %v1681_v20 = vpop.xlane.xlu0 %1680 }
 0x63c   : > { %v2540_v48 = vpop.eup %2539  ;;  %v1695_v49 = vmul.f32 0.03125, %v1681_v20 }
 0x63d   : > { %v1716_v50 = vmul.f32 %v2540_v48, %v3074_v45  ;;  %v1684_v43 = vpop.xlane.xlu1 %1683  ;;  %v1723_v51 = vmul.f32 %v1715_v47, %v437_v18 }
 0x63e   : > { %v2542_v52 = vpop.eup %2541  ;;  %v1703_v54 = vadd.f32 1e-05, %v1695_v49  ;;  %v1696_v55 = vmul.f32 0.03125, %v1684_v43 }
 0x63f   : > { %v1717_v56 = vmul.f32 %v2542_v52, %v3078_v59  ;;  %v1687_v57 = vpop.xlane.xlu0 %1686  ;;  %v1724_v58 = vmul.f32 %v1716_v50, %v437_v18  ;;  %v3134_v21 = vadd.f32 %v1723_v51, %v438_v53 }
 0x640   : > { %v2544_v46 = vpop.eup %2543  ;;  %2545 = vrsqrt.f32 %v1703_v54  ;;  %v1704_v44 = vadd.f32 1e-05, %v1696_v55  ;;  %v1697_v60 = vmul.f32 0.03125, %v1687_v57 }
 0x641   : > { %v1725_v61 = vmul.f32 %v1717_v56, %v437_v18  ;;  %v1718_v45 = vmul.f32 %v2544_v46, %v3083_v62  ;;  %v1690_v63 = vpop.xlane.xlu1 %1689  ;;  %v3136_v0 = vadd.f32 %v1724_v58, %v438_v53 }
 0x642   : > { %2547 = vrsqrt.f32 %v1704_v44  ;;  %v1705_v1 = vadd.f32 1e-05, %v1697_v60  ;;  %v1698_v3 = vmul.f32 0.03125, %v1690_v63  ;;  %v440_v44 = vld [vmem:[%s3289_s11 + $0x10] ss:$0 sm:$0xff] }
 0x643   : > { %v1726_v4 = vmul.f32 %v1718_v45, %v437_v18  ;;  %v1739_v59 = vpack.c.bf16 %v3136_v0, %v3134_v21  ;;  %v3140_v6 = vadd.f32 %v1725_v61, %v438_v53 }
 0x644   : > { %2549 = vrsqrt.f32 %v1705_v1  ;;  %v1706_v5 = vadd.f32 1e-05, %v1698_v3 }
 0x645   : > { %v3142_v8 = vadd.f32 %v1726_v4, %v438_v53  ;;  %2398 = vmatprep.mubr.msk.bf16.mxu0 %vm478_vm0, %v1739_v59 }
 0x646   : > { %2551 = vrsqrt.f32 %v1706_v5 }
 0x647   : > { %v1740_v62 = vpack.c.bf16 %v3142_v8, %v3140_v6 }
 0x649   : > { %2399 = vmatmul.mubr.msk.bf16.vlgmr.msra.gmra.mrb[56].mxu0 %vm478_vm0, %v1740_v62 }
 0x64a   : > { %v2546_v9 = vpop.eup %2545 }
 0x64b   : > { %v1719_v11 = vmul.f32 %v2546_v9, %v3092_v7 }
 0x64c   : > { %v2548_v2 = vpop.eup %2547 }
 0x64d   : > { %v1720_v13 = vmul.f32 %v2548_v2, %v3094_v10  ;;  %v1727_v16 = vmul.f32 %v1719_v11, %v437_v18 }
 0x64e   : > { %v2550_v23 = vpop.eup %2549 }
 0x64f   : > { %v1721_v15 = vmul.f32 %v2550_v23, %v3098_v14  ;;  %v1728_v28 = vmul.f32 %v1720_v13, %v437_v18  ;;  %v3152_v26 = vadd.f32 %v1727_v16, %v438_v53 }
 0x650   : > { %v2552_v22 = vpop.eup %2551 }
 0x651   : > { %v1722_v19 = vmul.f32 %v2552_v22, %v3103_v12  ;;  %v3154_v24 = vadd.f32 %v1728_v28, %v438_v53  ;;  %v1729_v32 = vmul.f32 %v1721_v15, %v437_v18  ;;  %v2503_v12 = vld [vmem:[%s3288_s10 + $0x10] sm:$0xff]  }
 0x652   : > { %2410 = vmatprep.subr.bf16.mxu1 %v2503_v12 }
 0x653   : > { %v1741_v34 = vpack.c.bf16 %v3154_v24, %v3152_v26  ;;  %v1730_v7 = vmul.f32 %v1722_v19, %v437_v18  ;;  %v3159_v10 = vadd.f32 %v1729_v32, %v438_v53  ;;  %2411 = vmatpush3.bf16.msra.mxu1 %v2503_v12 }
 0x654   : > { %2412 = vmatprep.subr.bf16.mxu1 %v2504_v29 }
 0x655   : > { %2402 = vmatprep.mubr.msk.bf16.mxu0 %vm478_vm0, %v1741_v34  ;;  %v3161_v25 = vadd.f32 %v1730_v7, %v438_v53 }
 0x657   : > { %v1742_v14 = vpack.c.bf16 %v3161_v25, %v3159_v10  ;;  %2413 = vmatpush3.bf16.msra.mxu1 %v2504_v29 }
 0x659   : > { %2403 = vmatmul.mubr.msk.bf16.gmra.mrb[60].mxu0 %vm478_vm0, %v1742_v14 }
 0x71c   : > { %v2400_v30 = vpop.f32.mrb[56].mxu0 }
 0x71d   : > { %v1814_v31 = vadd.f32 %v2400_v30, %v439_v27  ;;  %v1805_v35 = vpop.f32.mrb[57].mxu0 }
 0x71e   : > { %v1806_v36 = vadd.f32 %v1805_v35, %v439_v27  ;;  %v2401_v37 = vpop.f32.mrb[58].mxu0 }
 0x71f   : > { %v1817_v33 = vadd.f32 %v2401_v37, %v439_v27  ;;  %v1808_v38 = vpop.f32.mrb[59].mxu0  ;;  %v1838_v39 = vmax.f32 %v1814_v31, 0.0 }
 0x720   : > { %v1809_v40 = vadd.f32 %v1808_v38, %v439_v27  ;;  %v1836_v41 = vmax.f32 %v1806_v36, 0.0 }
 0x721   : > { %v1839_v42 = vmax.f32 %v1817_v33, 0.0 }
 0x722   : > { %v1837_v17 = vmax.f32 %v1809_v40, 0.0 }
 0x723   : > { %v1845_v18 = vpack.c.bf16 %v1839_v42, %v1838_v39 }
 0x724   : > { %v1844_v47 = vpack.c.bf16 %v1837_v17, %v1836_v41 }
 0x726   : > { %2414 = vmatprep.mubr.msk.bf16.mxu1 %vm889_vm1, %v1844_v47 }
 0x727   : > { %2415 = vmatmul.mubr.msk.bf16.vlgmr.msra.gmra.mrb[56].mxu1 %vm889_vm1, %v1845_v18 }
 0x72c   : > { %v2404_v20 = vpop.f32.mrb[60].mxu0 }
 0x72d   : > { %v1830_v48 = vadd.f32 %v2404_v20, %v439_v27  ;;  %v1821_v49 = vpop.f32.mrb[61].mxu0 }
 0x72e   : > { %v1822_v50 = vadd.f32 %v1821_v49, %v439_v27  ;;  %v2405_v43 = vpop.f32.mrb[62].mxu0 }
 0x72f   : > { %v1833_v51 = vadd.f32 %v2405_v43, %v439_v27  ;;  %v1824_v52 = vpop.f32.mrb[63].mxu0  ;;  %v1842_v54 = vmax.f32 %v1830_v48, 0.0 }
 0x730   : > { %v1825_v53 = vadd.f32 %v1824_v52, %v439_v27  ;;  %v1840_v56 = vmax.f32 %v1822_v50, 0.0 }
 0x731   : > { %v1843_v55 = vmax.f32 %v1833_v51, 0.0 }
 0x732   : > { %v1841_v57 = vmax.f32 %v1825_v53, 0.0 }
 0x733   : > { %v1847_v58 = vpack.c.bf16 %v1843_v55, %v1842_v54 }
 0x734   : > { %v1846_v46 = vpack.c.bf16 %v1841_v57, %v1840_v56 }
 0x736   : > { %2418 = vmatprep.mubr.msk.bf16.mxu1 %vm889_vm1, %v1846_v46 }
 0x737   : > { %2419 = vmatmul.mubr.msk.bf16.gmra.mrb[60].mxu1 %vm889_vm1, %v1847_v58 }
 0x7fa   : > { %v2416_v60 = vpop.f32.mrb[56].mxu1 }
 0x7fb   : > { %v1935_v61 = vadd.f32 %v2416_v60, %v440_v44  ;;  %v1926_v45 = vpop.f32.mrb[57].mxu1 }
 0x7fc   : > { %v1927_v63 = vadd.f32 %v1926_v45, %v440_v44  ;;  %v2417_v1 = vpop.f32.mrb[58].mxu1 }
 0x7fd   : > { %v1938_v3 = vadd.f32 %v2417_v1, %v440_v44  ;;  %v1929_v4 = vpop.f32.mrb[59].mxu1  ;;  %v1959_v59 = vadd.f32 %v1935_v61, %v3140_v6 }
 0x7fe   : > { %v1930_v5 = vadd.f32 %v1929_v4, %v440_v44  ;;  %v1957_v11 = vadd.f32 %v1927_v63, %v3134_v21 }
 0x7ff   : > { %v1971_v62 = vsel %vm478_vm0, %v1959_v59, 0.0  ;;  %v1960_v9 = vadd.f32 %v1938_v3, %v3142_v8 }
 0x800   : > { %1972 = vadd.xlane.f32.xlu0 %v1971_v62  ;;  %v1958_v13 = vadd.f32 %v1930_v5, %v3136_v0  ;;  %v1965_v16 = vsel %vm478_vm0, %v1957_v11, 0.0 }
 0x801   : > { %v1974_v2 = vsel %vm478_vm0, %v1960_v9, 0.0 }
 0x802   : > { %1975 = vadd.xlane.f32.xlu1 %v1974_v2  ;;  %v1968_v23 = vsel %vm478_vm0, %v1958_v13, 0.0 }
 0x804   : > { %1966 = vadd.xlane.f32.xlu0 %v1965_v16 }
 0x806   : > { %1969 = vadd.xlane.f32.xlu1 %v1968_v23 }
 0x80a   : > { %v2420_v6 = vpop.f32.mrb[60].mxu1 }
 0x80b   : > { %v1942_v15 = vpop.f32.mrb[61].mxu1  ;;  %v1951_v28 = vadd.f32 %v2420_v6, %v440_v44 }
 0x80c   : > { %v1943_v22 = vadd.f32 %v1942_v15, %v440_v44  ;;  %v2421_v19 = vpop.f32.mrb[62].mxu1 }
 0x80d   : > { %v1945_v8 = vpop.f32.mrb[63].mxu1  ;;  %v1954_v32 = vadd.f32 %v2421_v19, %v440_v44  ;;  %v1963_v14 = vadd.f32 %v1951_v28, %v3159_v10 }
 0x80e   : > { %v1946_v21 = vadd.f32 %v1945_v8, %v440_v44  ;;  %v1961_v34 = vadd.f32 %v1943_v22, %v3152_v26  ;;  %v441_v8 = vld [vmem:[%s3289_s11 + $0x11] ss:$0 sm:$0xff] }
 0x80f   : > { %v1964_v29 = vadd.f32 %v1954_v32, %v3161_v25  ;;  %v1983_v27 = vsel %vm478_vm0, %v1963_v14, 0.0 }
 0x810   : > { %v1977_v7 = vsel %vm478_vm0, %v1961_v34, 0.0  ;;  %v1962_v0 = vadd.f32 %v1946_v21, %v3154_v24 }
 0x811   : > { %1978 = vadd.xlane.f32.xlu0 %v1977_v7  ;;  %v1986_v30 = vsel %vm478_vm0, %v1964_v29, 0.0 }
 0x812   : > { %v1980_v12 = vsel %vm478_vm0, %v1962_v0, 0.0 }
 0x813   : > { %1981 = vadd.xlane.f32.xlu1 %v1980_v12 }
 0x815   : > { %1984 = vadd.xlane.f32.xlu0 %v1983_v27 }
 0x817   : > { %1987 = vadd.xlane.f32.xlu1 %v1986_v30 }
 0x88d   : > { %v1973_v31 = vpop.xlane.xlu0 %1972 }
 0x88e   : > { %v1991_v26 = vmul.f32 0.03125, %v1973_v31 }
 0x88f   : > { %v1976_v35 = vpop.xlane.xlu1 %1975 }
 0x890   : > { %v3198_v36 = vsub.f32 %v1959_v59, %v1991_v26  ;;  %v1992_v24 = vmul.f32 0.03125, %v1976_v35 }
 0x891   : > { %v1967_v37 = vpop.xlane.xlu0 %1966 }
 0x892   : > { %v3200_v10 = vsub.f32 %v1960_v9, %v1992_v24  ;;  %v1989_v33 = vmul.f32 0.03125, %v1967_v37  ;;  %v2007_v25 = vmul.f32 %v3198_v36, %v3198_v36 }
 0x893   : > { %v1970_v38 = vpop.xlane.xlu1 %1969 }
 0x894   : > { %v3204_v40 = vsub.f32 %v1957_v11, %v1989_v33  ;;  %v1990_v39 = vmul.f32 0.03125, %v1970_v38  ;;  %v2019_v42 = vsel %vm478_vm0, %v2007_v25, 0.0  ;;  %v2008_v41 = vmul.f32 %v3200_v10, %v3200_v10 }
 0x895   : > { %2020 = vadd.xlane.f32.xlu0 %v2019_v42 }
 0x896   : > { %v3209_v17 = vsub.f32 %v1958_v13, %v1990_v39  ;;  %v2022_v18 = vsel %vm478_vm0, %v2008_v41, 0.0  ;;  %v2005_v47 = vmul.f32 %v3204_v40, %v3204_v40 }
 0x897   : > { %2023 = vadd.xlane.f32.xlu1 %v2022_v18 }
 0x898   : > { %v2013_v20 = vsel %vm478_vm0, %v2005_v47, 0.0  ;;  %v2006_v48 = vmul.f32 %v3209_v17, %v3209_v17 }
 0x899   : > { %2014 = vadd.xlane.f32.xlu0 %v2013_v20 }
 0x89a   : > { %v2016_v49 = vsel %vm478_vm0, %v2006_v48, 0.0 }
 0x89b   : > { %2017 = vadd.xlane.f32.xlu1 %v2016_v49 }
 0x89e   : > { %v1979_v50 = vpop.xlane.xlu0 %1978 }
 0x89f   : > { %v1993_v43 = vmul.f32 0.03125, %v1979_v50 }
 0x8a0   : > { %v1982_v51 = vpop.xlane.xlu1 %1981 }
 0x8a1   : > { %v3218_v52 = vsub.f32 %v1961_v34, %v1993_v43  ;;  %v1994_v53 = vmul.f32 0.03125, %v1982_v51  ;;  %v442_v34 = vld [vmem:[%s3289_s11 + $0x12] ss:$0 sm:$0xff] }
 0x8a2   : > { %v1985_v54 = vpop.xlane.xlu0 %1984 }
 0x8a3   : > { %v3220_v55 = vsub.f32 %v1962_v0, %v1994_v53  ;;  %v1995_v56 = vmul.f32 0.03125, %v1985_v54  ;;  %v2009_v57 = vmul.f32 %v3218_v52, %v3218_v52 }
 0x8a4   : > { %v1988_v58 = vpop.xlane.xlu1 %1987 }
 0x8a5   : > { %v3224_v46 = vsub.f32 %v1963_v14, %v1995_v56  ;;  %v1996_v44 = vmul.f32 0.03125, %v1988_v58  ;;  %v2025_v60 = vsel %vm478_vm0, %v2009_v57, 0.0  ;;  %v2010_v61 = vmul.f32 %v3220_v55, %v3220_v55 }
 0x8a6   : > { %2026 = vadd.xlane.f32.xlu0 %v2025_v60 }
 0x8a7   : > { %v3229_v45 = vsub.f32 %v1964_v29, %v1996_v44  ;;  %v2028_v63 = vsel %vm478_vm0, %v2010_v61, 0.0  ;;  %v2011_v1 = vmul.f32 %v3224_v46, %v3224_v46 }
 0x8a8   : > { %2029 = vadd.xlane.f32.xlu1 %v2028_v63 }
 0x8a9   : > { %v2031_v3 = vsel %vm478_vm0, %v2011_v1, 0.0  ;;  %v2012_v4 = vmul.f32 %v3229_v45, %v3229_v45 }
 0x8aa   : > { %2032 = vadd.xlane.f32.xlu0 %v2031_v3 }
 0x8ab   : > { %v2034_v59 = vsel %vm478_vm0, %v2012_v4, 0.0 }
 0x8ac   : > { %2035 = vadd.xlane.f32.xlu1 %v2034_v59 }
 0x922   : > { %v2021_v5 = vpop.xlane.xlu0 %2020 }
 0x923   : > { %v2039_v62 = vmul.f32 0.03125, %v2021_v5 }
 0x924   : > { %v2024_v9 = vpop.xlane.xlu1 %2023 }
 0x925   : > { %v2047_v11 = vadd.f32 1e-05, %v2039_v62  ;;  %v2040_v2 = vmul.f32 0.03125, %v2024_v9 }
 0x926   : > { %v2015_v13 = vpop.xlane.xlu0 %2014 }
 0x927   : > { %2553 = vrsqrt.f32 %v2047_v11  ;;  %v2048_v16 = vadd.f32 1e-05, %v2040_v2  ;;  %v2037_v23 = vmul.f32 0.03125, %v2015_v13 }
 0x928   : > { %v2018_v6 = vpop.xlane.xlu1 %2017 }
 0x929   : > { %2555 = vrsqrt.f32 %v2048_v16  ;;  %v2045_v15 = vadd.f32 1e-05, %v2037_v23  ;;  %v2038_v28 = vmul.f32 0.03125, %v2018_v6 }
 0x92b   : > { %2557 = vrsqrt.f32 %v2045_v15  ;;  %v2046_v22 = vadd.f32 1e-05, %v2038_v28 }
 0x92d   : > { %2559 = vrsqrt.f32 %v2046_v22 }
 0x931   : > { %v2554_v19 = vpop.eup %2553 }
 0x932   : > { %v2063_v32 = vmul.f32 %v2554_v19, %v3198_v36 }
 0x933   : > { %v2556_v21 = vpop.eup %2555  ;;  %v2027_v7 = vpop.xlane.xlu0 %2026 }
 0x934   : > { %v2071_v0 = vmul.f32 %v2063_v32, %v441_v8  ;;  %v2064_v14 = vmul.f32 %v2556_v21, %v3200_v10  ;;  %v2041_v12 = vmul.f32 0.03125, %v2027_v7 }
 0x935   : > { %v2558_v29 = vpop.eup %2557  ;;  %v2030_v27 = vpop.xlane.xlu1 %2029 }
 0x936   : > { %v2079_v30 = vadd.f32 %v2071_v0, %v442_v34  ;;  %v2072_v31 = vmul.f32 %v2064_v14, %v441_v8  ;;  %v2061_v26 = vmul.f32 %v2558_v29, %v3204_v40  ;;  %v2049_v35 = vadd.f32 1e-05, %v2041_v12 }
 0x937   : > { %v2560_v36 = vpop.eup %2559  ;;  %v2042_v24 = vmul.f32 0.03125, %v2030_v27  ;;  %v2033_v37 = vpop.xlane.xlu0 %2032 }
 0x938   : > { %2087 = vst.msk [vmem:[%s3251_s18 + $0x10] sm:$0xff] %vm478_vm0, %v2079_v30  ;;  %v2080_v10 = vadd.f32 %v2072_v31, %v442_v34  ;;  %v2069_v33 = vmul.f32 %v2061_v26, %v441_v8  ;;  %v2062_v25 = vmul.f32 %v2560_v36, %v3209_v17  ;;  %2561 = vrsqrt.f32 %v2049_v35 }
 0x939   : > { %v2050_v38 = vadd.f32 1e-05, %v2042_v24  ;;  %v2043_v39 = vmul.f32 0.03125, %v2033_v37  ;;  %v2036_v42 = vpop.xlane.xlu1 %2035 }
 0x93a   : > { %2088 = vst.msk [vmem:[%s3251_s18 + $0x18] sm:$0xff] %vm478_vm0, %v2080_v10  ;;  %v2077_v41 = vadd.f32 %v2069_v33, %v442_v34  ;;  %v2070_v40 = vmul.f32 %v2062_v25, %v441_v8  ;;  %v2044_v18 = vmul.f32 0.03125, %v2036_v42 }
 0x93b   : > { %2563 = vrsqrt.f32 %v2050_v38  ;;  %v2051_v47 = vadd.f32 1e-05, %v2043_v39 }
 0x93c   : > { %2085 = vst.msk [vmem:[%s3251_s18] sm:$0xff] %vm478_vm0, %v2077_v41  ;;  %v2078_v20 = vadd.f32 %v2070_v40, %v442_v34  ;;  %v2052_v48 = vadd.f32 1e-05, %v2044_v18 }
 0x93d   : > { %2565 = vrsqrt.f32 %v2051_v47 }
 0x93e   : > { %2086 = vst.msk [vmem:[%s3251_s18 + $0x8] sm:$0xff] %vm478_vm0, %v2078_v20  ;;  %2567 = vrsqrt.f32 %v2052_v48 }
 0x942   : > { %v2562_v17 = vpop.eup %2561 }
 0x943   : > { %v2065_v49 = vmul.f32 %v2562_v17, %v3218_v52 }
 0x945   : > { %v2564_v50 = vpop.eup %2563  ;;  %v2073_v43 = vmul.f32 %v2065_v49, %v441_v8 }
 0x946   : > { %v2066_v51 = vmul.f32 %v2564_v50, %v3220_v55 }
 0x947   : > { %v2566_v53 = vpop.eup %2565  ;;  %v2081_v54 = vadd.f32 %v2073_v43, %v442_v34 }
 0x948   : > { %v2568_v56 = vpop.eup %2567  ;;  %v2074_v57 = vmul.f32 %v2066_v51, %v441_v8  ;;  %v2067_v58 = vmul.f32 %v2566_v53, %v3224_v46 }
 0x949   : > { %2089 = vst.msk [vmem:[%s3251_s18 + $0x20] sm:$0xff] %vm478_vm0, %v2081_v54  ;;  %v2068_v44 = vmul.f32 %v2568_v56, %v3229_v45 }
 0x94a   : > { %v2082_v60 = vadd.f32 %v2074_v57, %v442_v34  ;;  %v2075_v61 = vmul.f32 %v2067_v58, %v441_v8 }
 0x94b   : > { %v2076_v63 = vmul.f32 %v2068_v44, %v441_v8 }
 0x94c   : > { %2090 = vst.msk [vmem:[%s3251_s18 + $0x28] sm:$0xff] %vm478_vm0, %v2082_v60  ;;  %v2083_v52 = vadd.f32 %v2075_v61, %v442_v34 }
 0x94d   : > { %v2084_v1 = vadd.f32 %v2076_v63, %v442_v34 }
 0x94e   : > { %2091 = vst.msk [vmem:[%s3251_s18 + $0x30] sm:$0xff] %vm478_vm0, %v2083_v52 }
 0x94f   : > { %2092 = vst.msk [vmem:[%s3251_s18 + $0x38] sm:$0xff] %vm478_vm0, %v2084_v1 }
 0x950 PF: > { %s22_s21 = sadd.s32 1, %s2583_s21  }
 0x951   : > { %p19_p4 = scmp.ge.s32.totalorder %s22_s21, 4  }
 0x953   :  { %21 = sbr.rel (!%p19_p4) target bundleno = 1 (0x1), region = 100 }

</bundles_post_ra>
